<compile_context>
chip_gen: v5e
topology: v5e:2x2
jax: 0.10.0
libtpu: 0.0.40
codegen_flags: <defaults>
</compile_context>

<pallas_src>
import functools
import math

import jax
import jax.numpy as jnp
from jax.experimental import pallas as pl
from jax.experimental.pallas import tpu as pltpu

HIDDEN = 256


def _round_up(x, m):
    return ((x + m - 1) // m) * m


def _critic_kernel(sa_ref,
                   w14_ref, b14_ref,
                   w2_ref, b2_ref,
                   w5_ref, b5_ref,
                   w3r_ref, w6r_ref, b36_ref,
                   q_ref):
    cdt = w2_ref.dtype  # matmul operand dtype (bf16 or f32)

    # ---- layer 1 of BOTH heads, one fused matmul: [TB, 512] = sa @ W14 + b14 ----
    hg = jnp.dot(sa_ref[...], w14_ref[...], preferred_element_type=jnp.float32)
    hg = jnp.maximum(hg + b14_ref[...], 0.0)

    h = hg[:, :HIDDEN].astype(cdt)   # Q1 branch activations
    g = hg[:, HIDDEN:].astype(cdt)   # Q2 branch activations

    # ---- layer 2 (two 256x256 matmuls; a block-diagonal fusion would double FLOPs) ----
    h = jnp.maximum(
        jnp.dot(h, w2_ref[...], preferred_element_type=jnp.float32) + b2_ref[...], 0.0)
    g = jnp.maximum(
        jnp.dot(g, w5_ref[...], preferred_element_type=jnp.float32) + b5_ref[...], 0.0)

    # ---- layer 3 OFF the MXU: VPU broadcast-mul + XLU lane reduction, all in f32 ----
    q1 = jnp.sum(h * w3r_ref[...], axis=-1, keepdims=True)   # [TB, 1]
    q2 = jnp.sum(g * w6r_ref[...], axis=-1, keepdims=True)   # [TB, 1]
    q_ref[...] = jnp.concatenate([q1, q2], axis=1) + b36_ref[...]


def pack_critic_params(params, *, use_bf16=True):
    """One-time weight preprocessing, hoisted out of the per-call hot path.

    Fuses the twin heads' first layers, packs biases, casts MXU operands to bf16, and
    reshapes the layer-3 weights into f32 rows for the VPU reduction. Call once per
    parameter update and pass the result to critic_forward."""
    cdt = jnp.bfloat16 if use_bf16 else jnp.float32
    return {
        "w14": jnp.concatenate([params["w1"], params["w4"]], axis=1).astype(cdt),  # [in, 512]
        "b14": jnp.concatenate([params["b1"], params["b4"]], axis=1),              # [1, 512] f32
        "w2": params["w2"].astype(cdt),                                            # [256, 256]
        "b2": params["b2"],                                                        # [1, 256]  f32
        "w5": params["w5"].astype(cdt),                                            # [256, 256]
        "b5": params["b5"],                                                        # [1, 256]  f32
        "w3r": params["w3"].reshape(1, HIDDEN).astype(jnp.float32),                # [1, 256]  f32
        "w6r": params["w6"].reshape(1, HIDDEN).astype(jnp.float32),                # [1, 256]  f32
        "b36": jnp.concatenate([params["b3"], params["b6"]], axis=1),              # [1, 2]    f32
    }


def critic_forward(state, action, packed, *, block_b=1024):
    """Pallas implementation of Critic.forward. Returns (q1, q2), each [B, 1] float32."""
    B = state.shape[0]
    cdt = packed["w2"].dtype

    # torch.cat([state, action], 1) done once in the wrapper: ~64 B/row of extra HBM traffic
    # is negligible (kernel is MXU-bound), and it halves the layer-1 MXU pushes.
    sa = jnp.concatenate([state, action], axis=1).astype(cdt)
    in_dim = sa.shape[1]

    # --- batch tiling: multiple of 16 for bf16 sublane packing (8 for f32), pad ragged B ---
    mult = 16 if cdt == jnp.bfloat16 else 8
    b_aligned = _round_up(B, mult)
    tb = _round_up(min(block_b, b_aligned), mult)
    # v7x megacore: keep >= 2 grid steps so the "parallel" batch axis spans both TensorCores.
    if b_aligned >= 2 * 128:
        tb = min(tb, _round_up(max(128, (b_aligned + 1) // 2), mult))
    b_pad = _round_up(b_aligned, tb)
    pad = b_pad - B
    if pad:
        sa = jnp.pad(sa, ((0, pad), (0, 0)))

    def _resident(x):
        # full-array block, constant index -> DMA'd once, stays in VMEM across the grid
        return pl.BlockSpec(x.shape, lambda i: (0, 0))

    in_specs = [
        pl.BlockSpec((tb, in_dim), lambda i: (i, 0)),
        _resident(packed["w14"]), _resident(packed["b14"]),
        _resident(packed["w2"]), _resident(packed["b2"]),
        _resident(packed["w5"]), _resident(packed["b5"]),
        _resident(packed["w3r"]), _resident(packed["w6r"]), _resident(packed["b36"]),
    ]
    out_specs = pl.BlockSpec((tb, 2), lambda i: (i, 0))

    q = pl.pallas_call(
        _critic_kernel,
        out_shape=jax.ShapeDtypeStruct((b_pad, 2), jnp.float32),
        grid=(b_pad // tb,),
        in_specs=in_specs,
        out_specs=out_specs,
        compiler_params=pltpu.CompilerParams(
            dimension_semantics=("parallel",)),
    )(sa,
      packed["w14"], packed["b14"],
      packed["w2"], packed["b2"],
      packed["w5"], packed["b5"],
      packed["w3r"], packed["w6r"], packed["b36"])

    q = q[:B]
    return q[:, 0:1], q[:, 1:2]


def init_critic_params(key, state_dim, action_dim):
    """Deterministic init mimicking PyTorch nn.Linear default (uniform +-1/sqrt(fan_in)).
    Weights stored as [in_features, out_features]; biases as [1, out_features]."""
    in_dim = state_dim + action_dim
    dims = [
        ("w1", "b1", in_dim, HIDDEN),
        ("w2", "b2", HIDDEN, HIDDEN),
        ("w3", "b3", HIDDEN, 1),
        ("w4", "b4", in_dim, HIDDEN),
        ("w5", "b5", HIDDEN, HIDDEN),
        ("w6", "b6", HIDDEN, 1),
    ]
    params = {}
    keys = jax.random.split(key, 2 * len(dims))
    for i, (wn, bn, fin, fout) in enumerate(dims):
        bound = 1.0 / math.sqrt(fin)
        params[wn] = jax.random.uniform(keys[2 * i], (fin, fout),
                                        minval=-bound, maxval=bound,
                                        dtype=jnp.float32)
        params[bn] = jax.random.uniform(keys[2 * i + 1], (1, fout),
                                        minval=-bound, maxval=bound,
                                        dtype=jnp.float32)
    return params


def _reference_forward(state, action, params):
    sa = jnp.concatenate([state, action], axis=1)
    h = jax.nn.relu(sa @ params["w1"] + params["b1"])
    h = jax.nn.relu(h @ params["w2"] + params["b2"])
    q1 = h @ params["w3"] + params["b3"]
    g = jax.nn.relu(sa @ params["w4"] + params["b4"])
    g = jax.nn.relu(g @ params["w5"] + params["b5"])
    q2 = g @ params["w6"] + params["b6"]
    return q1, q2


if __name__ == "__main__":
    # ragged batch of 200 + tile 128 -> exercises padding AND a 2-step grid
    state_dim, action_dim, batch = 11, 5, 200

    key = jax.random.PRNGKey(0)
    k_params, k_state, k_action = jax.random.split(key, 3)

    params = init_critic_params(k_params, state_dim, action_dim)
    state = jax.random.normal(k_state, (batch, state_dim), dtype=jnp.float32)
    action = jax.random.normal(k_action, (batch, action_dim), dtype=jnp.float32)

    # Weight prep hoisted out of the hot path (done once per parameter update).
    packed_bf16 = pack_critic_params(params, use_bf16=True)
    packed_f32 = pack_critic_params(params, use_bf16=False)

    fwd = jax.jit(functools.partial(critic_forward, block_b=128))

    # bf16-MXU path (default perf config).
    q1, q2 = fwd(state, action, packed_bf16)
    jax.block_until_ready((q1, q2))

    # exact f32 path for a tight numerical check of the kernel structure.
    q1f, q2f = fwd(state, action, packed_f32)
    jax.block_until_ready((q1f, q2f))

    r1, r2 = _reference_forward(state, action, params)
    assert q1.shape == (batch, 1) and q2.shape == (batch, 1)
    assert jnp.allclose(q1f, r1, atol=1e-4, rtol=1e-4)
    assert jnp.allclose(q2f, r2, atol=1e-4, rtol=1e-4)
    assert jnp.allclose(q1, r1, atol=3e-2, rtol=3e-2)
    assert jnp.allclose(q2, r2, atol=3e-2, rtol=3e-2)

    print("KERNEL_OK")
</pallas_src>

<mosaic_0001>
module attributes {stable_mosaic.version = 11 : i64} {
  func.func @_critic_kernel(%arg0: i32, %arg1: memref<128x16xbf16, #tpu.memory_space<vmem>>, %arg2: memref<16x512xbf16, #tpu.memory_space<vmem>>, %arg3: memref<1x512xf32, #tpu.memory_space<vmem>>, %arg4: memref<256x256xbf16, #tpu.memory_space<vmem>>, %arg5: memref<1x256xf32, #tpu.memory_space<vmem>>, %arg6: memref<256x256xbf16, #tpu.memory_space<vmem>>, %arg7: memref<1x256xf32, #tpu.memory_space<vmem>>, %arg8: memref<1x256xf32, #tpu.memory_space<vmem>>, %arg9: memref<1x256xf32, #tpu.memory_space<vmem>>, %arg10: memref<1x2xf32, #tpu.memory_space<vmem>>, %arg11: memref<128x2xf32, #tpu.memory_space<vmem>>) attributes {dimension_semantics = [#tpu.dimension_semantics<parallel>], iteration_bounds = array<i64: 2>, scalar_prefetch = 0 : i64, scratch_operands = 0 : i64, tpu.core_type = #tpu.core_type<tc>, window_params = [{transform_indices = @transform_0, window_bounds = array<i64: 128, 16>}, {pipeline_mode = #tpu.pipeline_mode<synchronous>, transform_indices = @transform_1, window_bounds = array<i64: 16, 512>}, {pipeline_mode = #tpu.pipeline_mode<synchronous>, transform_indices = @transform_2, window_bounds = array<i64: 1, 512>}, {pipeline_mode = #tpu.pipeline_mode<synchronous>, transform_indices = @transform_3, window_bounds = array<i64: 256, 256>}, {pipeline_mode = #tpu.pipeline_mode<synchronous>, transform_indices = @transform_4, window_bounds = array<i64: 1, 256>}, {pipeline_mode = #tpu.pipeline_mode<synchronous>, transform_indices = @transform_5, window_bounds = array<i64: 256, 256>}, {pipeline_mode = #tpu.pipeline_mode<synchronous>, transform_indices = @transform_6, window_bounds = array<i64: 1, 256>}, {pipeline_mode = #tpu.pipeline_mode<synchronous>, transform_indices = @transform_7, window_bounds = array<i64: 1, 256>}, {pipeline_mode = #tpu.pipeline_mode<synchronous>, transform_indices = @transform_8, window_bounds = array<i64: 1, 256>}, {pipeline_mode = #tpu.pipeline_mode<synchronous>, transform_indices = @transform_9, window_bounds = array<i64: 1, 2>}, {transform_indices = @transform_10, window_bounds = array<i64: 128, 2>}]} {
    %c0 = arith.constant 0 : index
    %c0_0 = arith.constant 0 : index
    %0 = vector.load %arg1[%c0, %c0_0] : memref<128x16xbf16, #tpu.memory_space<vmem>>, vector<128x16xbf16>
    %c0_1 = arith.constant 0 : index
    %c0_2 = arith.constant 0 : index
    %1 = vector.load %arg2[%c0_1, %c0_2] : memref<16x512xbf16, #tpu.memory_space<vmem>>, vector<16x512xbf16>
    %cst = arith.constant dense<0.000000e+00> : vector<128x512xf32>
    %2 = tpu.matmul %0, %1, %cst {dimension_numbers = #tpu.dot_dimension_numbers<[1], [0], [0], [1], [0, 0, 1, 1], [], []>} : vector<128x16xbf16>, vector<16x512xbf16>, vector<128x512xf32> -> vector<128x512xf32>
    %c0_3 = arith.constant 0 : index
    %c0_4 = arith.constant 0 : index
    %3 = vector.load %arg3[%c0_3, %c0_4] : memref<1x512xf32, #tpu.memory_space<vmem>>, vector<1x512xf32>
    %4 = vector.broadcast %3 : vector<1x512xf32> to vector<128x512xf32>
    %5 = arith.addf %2, %4 : vector<128x512xf32>
    %cst_5 = arith.constant 0.000000e+00 : f32
    %6 = vector.broadcast %cst_5 : f32 to vector<128x512xf32>
    %7 = arith.maximumf %5, %6 : vector<128x512xf32>
    %8 = vector.extract_strided_slice %7 {offsets = [0, 0], sizes = [128, 256], strides = [1, 1]} : vector<128x512xf32> to vector<128x256xf32>
    %9 = arith.truncf %8 : vector<128x256xf32> to vector<128x256xbf16>
    %10 = vector.extract_strided_slice %7 {offsets = [0, 256], sizes = [128, 256], strides = [1, 1]} : vector<128x512xf32> to vector<128x256xf32>
    %11 = arith.truncf %10 : vector<128x256xf32> to vector<128x256xbf16>
    %c0_6 = arith.constant 0 : index
    %c0_7 = arith.constant 0 : index
    %12 = vector.load %arg4[%c0_6, %c0_7] : memref<256x256xbf16, #tpu.memory_space<vmem>>, vector<256x256xbf16>
    %cst_8 = arith.constant dense<0.000000e+00> : vector<128x256xf32>
    %13 = tpu.matmul %9, %12, %cst_8 {dimension_numbers = #tpu.dot_dimension_numbers<[1], [0], [0], [1], [0, 0, 1, 1], [], []>} : vector<128x256xbf16>, vector<256x256xbf16>, vector<128x256xf32> -> vector<128x256xf32>
    %c0_9 = arith.constant 0 : index
    %c0_10 = arith.constant 0 : index
    %14 = vector.load %arg5[%c0_9, %c0_10] : memref<1x256xf32, #tpu.memory_space<vmem>>, vector<1x256xf32>
    %15 = vector.broadcast %14 : vector<1x256xf32> to vector<128x256xf32>
    %16 = arith.addf %13, %15 : vector<128x256xf32>
    %cst_11 = arith.constant 0.000000e+00 : f32
    %17 = vector.broadcast %cst_11 : f32 to vector<128x256xf32>
    %18 = arith.maximumf %16, %17 : vector<128x256xf32>
    %c0_12 = arith.constant 0 : index
    %c0_13 = arith.constant 0 : index
    %19 = vector.load %arg6[%c0_12, %c0_13] : memref<256x256xbf16, #tpu.memory_space<vmem>>, vector<256x256xbf16>
    %cst_14 = arith.constant dense<0.000000e+00> : vector<128x256xf32>
    %20 = tpu.matmul %11, %19, %cst_14 {dimension_numbers = #tpu.dot_dimension_numbers<[1], [0], [0], [1], [0, 0, 1, 1], [], []>} : vector<128x256xbf16>, vector<256x256xbf16>, vector<128x256xf32> -> vector<128x256xf32>
    %c0_15 = arith.constant 0 : index
    %c0_16 = arith.constant 0 : index
    %21 = vector.load %arg7[%c0_15, %c0_16] : memref<1x256xf32, #tpu.memory_space<vmem>>, vector<1x256xf32>
    %22 = vector.broadcast %21 : vector<1x256xf32> to vector<128x256xf32>
    %23 = arith.addf %20, %22 : vector<128x256xf32>
    %cst_17 = arith.constant 0.000000e+00 : f32
    %24 = vector.broadcast %cst_17 : f32 to vector<128x256xf32>
    %25 = arith.maximumf %23, %24 : vector<128x256xf32>
    %c0_18 = arith.constant 0 : index
    %c0_19 = arith.constant 0 : index
    %26 = vector.load %arg8[%c0_18, %c0_19] : memref<1x256xf32, #tpu.memory_space<vmem>>, vector<1x256xf32>
    %27 = vector.broadcast %26 : vector<1x256xf32> to vector<128x256xf32>
    %28 = arith.mulf %18, %27 : vector<128x256xf32>
    %cst_20 = arith.constant dense<0.000000e+00> : vector<128xf32>
    %29 = vector.multi_reduction <add>, %28, %cst_20 [1] : vector<128x256xf32> to vector<128xf32>
    %30 = vector.shape_cast %29 : vector<128xf32> to vector<128x1xf32>
    %c0_21 = arith.constant 0 : index
    %c0_22 = arith.constant 0 : index
    %31 = vector.load %arg9[%c0_21, %c0_22] : memref<1x256xf32, #tpu.memory_space<vmem>>, vector<1x256xf32>
    %32 = vector.broadcast %31 : vector<1x256xf32> to vector<128x256xf32>
    %33 = arith.mulf %25, %32 : vector<128x256xf32>
    %cst_23 = arith.constant dense<0.000000e+00> : vector<128xf32>
    %34 = vector.multi_reduction <add>, %33, %cst_23 [1] : vector<128x256xf32> to vector<128xf32>
    %35 = vector.shape_cast %34 : vector<128xf32> to vector<128x1xf32>
    %36 = tpu.concatenate %30, %35 in 1 : vector<128x1xf32>, vector<128x1xf32> -> vector<128x2xf32>
    %c0_24 = arith.constant 0 : index
    %c0_25 = arith.constant 0 : index
    %37 = vector.load %arg10[%c0_24, %c0_25] : memref<1x2xf32, #tpu.memory_space<vmem>>, vector<1x2xf32>
    %38 = vector.broadcast %37 : vector<1x2xf32> to vector<128x2xf32>
    %39 = arith.addf %36, %38 : vector<128x2xf32>
    %c0_26 = arith.constant 0 : index
    %c0_27 = arith.constant 0 : index
    %40 = vector.load %arg11[%c0_26, %c0_27] : memref<128x2xf32, #tpu.memory_space<vmem>>, vector<128x2xf32>
    tpu.vector_store %arg11[%c0_26, %c0_27], %39 {strides = array<i32>} : memref<128x2xf32, #tpu.memory_space<vmem>>, vector<128x2xf32>,
    return
  }
  func.func @transform_0(%arg0: i32) -> (i32, i32) {
    %c0_i32 = arith.constant 0 : i32
    %c0_i32_0 = arith.constant 0 : i32
    return %arg0, %c0_i32 : i32, i32
  }
  func.func @transform_1(%arg0: i32) -> (i32, i32) {
    %c0_i32 = arith.constant 0 : i32
    %c0_i32_0 = arith.constant 0 : i32
    %c0_i32_1 = arith.constant 0 : i32
    return %c0_i32, %c0_i32_0 : i32, i32
  }
  func.func @transform_2(%arg0: i32) -> (i32, i32) {
    %c0_i32 = arith.constant 0 : i32
    %c0_i32_0 = arith.constant 0 : i32
    %c0_i32_1 = arith.constant 0 : i32
    return %c0_i32, %c0_i32_0 : i32, i32
  }
  func.func @transform_3(%arg0: i32) -> (i32, i32) {
    %c0_i32 = arith.constant 0 : i32
    %c0_i32_0 = arith.constant 0 : i32
    %c0_i32_1 = arith.constant 0 : i32
    return %c0_i32, %c0_i32_0 : i32, i32
  }
  func.func @transform_4(%arg0: i32) -> (i32, i32) {
    %c0_i32 = arith.constant 0 : i32
    %c0_i32_0 = arith.constant 0 : i32
    %c0_i32_1 = arith.constant 0 : i32
    return %c0_i32, %c0_i32_0 : i32, i32
  }
  func.func @transform_5(%arg0: i32) -> (i32, i32) {
    %c0_i32 = arith.constant 0 : i32
    %c0_i32_0 = arith.constant 0 : i32
    %c0_i32_1 = arith.constant 0 : i32
    return %c0_i32, %c0_i32_0 : i32, i32
  }
  func.func @transform_6(%arg0: i32) -> (i32, i32) {
    %c0_i32 = arith.constant 0 : i32
    %c0_i32_0 = arith.constant 0 : i32
    %c0_i32_1 = arith.constant 0 : i32
    return %c0_i32, %c0_i32_0 : i32, i32
  }
  func.func @transform_7(%arg0: i32) -> (i32, i32) {
    %c0_i32 = arith.constant 0 : i32
    %c0_i32_0 = arith.constant 0 : i32
    %c0_i32_1 = arith.constant 0 : i32
    return %c0_i32, %c0_i32_0 : i32, i32
  }
  func.func @transform_8(%arg0: i32) -> (i32, i32) {
    %c0_i32 = arith.constant 0 : i32
    %c0_i32_0 = arith.constant 0 : i32
    %c0_i32_1 = arith.constant 0 : i32
    return %c0_i32, %c0_i32_0 : i32, i32
  }
  func.func @transform_9(%arg0: i32) -> (i32, i32) {
    %c0_i32 = arith.constant 0 : i32
    %c0_i32_0 = arith.constant 0 : i32
    %c0_i32_1 = arith.constant 0 : i32
    return %c0_i32, %c0_i32_0 : i32, i32
  }
  func.func @transform_10(%arg0: i32) -> (i32, i32) {
    %c0_i32 = arith.constant 0 : i32
    %c0_i32_0 = arith.constant 0 : i32
    return %arg0, %c0_i32 : i32, i32
  }
}

</mosaic_0001>

<bundles_post_ra>
// kernel: critic_forward.1
= control target key start
LH: loop header
LB: loop body
LE: loop exit
PB: predicated region body
PF: predicated region fallthrough
CT: control target
= control target key end

     0   :  { %15 = vsyncpa [#allocation3], 0  ;;  %s2481_s13 = smov 0   ;;  %s3171_s0 = inlined_call_operand.vmem [shape: bf16[256,16], index: 0, kind: input, shape index: {}]   ;;  %s3172_s1 = inlined_call_operand.vmem [shape: bf16[16,512], index: 1, kind: input, shape index: {}]   ;;  %s3173_s2 = inlined_call_operand.vmem [shape: f32[1,512], index: 2, kind: input, shape index: {}]   ;;  %s3174_s3 = inlined_call_operand.vmem [shape: bf16[256,256], index: 3, kind: input, shape index: {}]   ;;  %s3175_s4 = inlined_call_operand.vmem [shape: f32[1,256], index: 4, kind: input, shape index: {}]   ;;  %s3176_s5 = inlined_call_operand.hbm [shape: bf16[256,256], index: 5, kind: input, shape index: {}]   ;;  %s3177_s6 = inlined_call_operand.vmem [shape: f32[1,256], index: 6, kind: input, shape index: {}]   ;;  %s3178_s7 = inlined_call_operand.vmem [shape: f32[1,256], index: 7, kind: input, shape index: {}]   ;;  %s3179_s8 = inlined_call_operand.vmem [shape: f32[1,256], index: 8, kind: input, shape index: {}]   ;;  %s3180_s9 = inlined_call_operand.vmem [shape: f32[1,2], index: 9, kind: input, shape index: {}]   ;;  %s3181_s10 = inlined_call_operand.vmem [shape: f32[256,2], index: 10, kind: output, shape index: {}]  }
   0x1 LB: > { %s290_s16 = sshll.u32 %s3176_s5, 4  ;;  %s1934_s17 = sadd.s32 4294967295, %s2421_s13   ;;  %s2421_s13 = sphi %s2481_s13, %s21_s13   ;;  %s291_s16 = int_to_ptr.hbm [resolvable:$true] %s290_s16 }
   0x2   : > { %p1936_p0 = scmp.ge.s32.totalorder %s2421_s13, 1  ;;  %p267_p1 = scmp.lt.s32.totalorder %s2421_s13, 3 }
   0x3   : > { %p2367_p2 = scmp.eq.s32.totalorder %s1934_s17, 0  ;;  %s2423_s18 = smov [#allocation2]  }
   0x4   : > { %p268_p3 = pnand %p1936_p0, %p267_p1  ;;  %s292_s19 = sshll.u32 %s2423_s18, 4  ;;  %s293_s19 = int_to_ptr.vmem [resolvable:$true] %s292_s19 }
   0x5   : > { %s2424_s20 = smov 128   ;;  %s2425_s21 = smov 8  }
   0x6   : > { %p2363_p4 = pneg %p268_p3  ;;  %329 = sbr.rel (%p268_p3) target bundleno = 669 (0x29d), region = 60 }
   0x8   : > { %p2364_p5 = pnand %p2367_p2, %p2363_p4 }
   0xa   : > { %2366 = dma.hbm_to_vmem [thread:$0]  (!%p2364_p5), %s291_s16, 4096, %s293_s19, [#allocation3], %s2424_s20, %s2424_s20, %s2425_s21  }
   0xb   : > { %2416 = dma.done.wait (%p2367_p2), [#allocation3], 4096  }
   0xc   : > { %2418 = vsyncadd (%p2367_p2), [#allocation3], 4294963200  ;;  %s1941_s22 = sshll.u32 %s1934_s17, 4  ;;  %v1979_v0 = vld [vmem:[%s3172_s1] sm:$0xf]  ;;  %vm471_vm0 = vcmask 130048  }
   0xd   : > { %p369_p6 = scmp.lt.s32.totalorder %s1941_s22, 31  ;;  %v2293_v1 = vld [vmem:[%s3172_s1 + $0xc] sm:$0xf0]  ;;  %v2291_v2 = vld [vmem:[%s3172_s1 + $0x4] sm:$0xf]  ;;  %vm1812_vm1 = vcmask 7168  }
   0xe   : > { %v1980_v3 = vor.u32 %v2293_v1, %v1979_v0  ;;  %v1981_v4 = vld [vmem:[%s3172_s1 + $0x10] sm:$0xf0]  ;;  %v1987_v6 = vld [vmem:[%s3172_s1 + $0x8] sm:$0xf]  ;;  %v2294_v8 = vld [vmem:[%s3172_s1 + $0x14] sm:$0xf0] }
   0xf   : > { %s3183_s22 = smov (!%p369_p6, %s1941_s22), 31  ;;  %v1984_v7 = vor.u32 %v2291_v2, %v1981_v4  ;;  %v2292_v9 = vld [vmem:[%s3172_s1 + $0xc] sm:$0xf]  ;;  %v1989_v10 = vld [vmem:[%s3172_s1 + $0x18] sm:$0xf0]  ;;  %v1988_v11 = vor.u32 %v2294_v8, %v1987_v6  ;;  %vm1849_vm2 = vcmask 15360  }
  0x10   : > { %s1942_s23 = sshll.u32 %s3183_s22, 2  ;;  %503 = vmatpush.bf16.msra.mxu0 %v1980_v3  ;;  %v1992_v12 = vor.u32 %v2292_v9, %v1989_v10  ;;  %v2309_v13 = vld [vmem:[%s3174_s3 + $0x74] sm:$0xf]  ;;  %v2085_v14 = vld [vmem:[%s3174_s3 + $0x78] sm:$0xf0]  ;;  %s1944_s27 = sshll.u32 %s3183_s22, 3 }
  0x11   : > { %s2498_s26 = scalar_lea.vmem %s3171_s0, %s1942_s23  ;;  %v2325_v15 = vld [vmem:[%s3174_s3 + $0xf4] sm:$0xf]  ;;  %552 = vmatpush.bf16.msra.mxu1 %v1984_v7  ;;  %v2088_v16 = vor.u32 %v2309_v13, %v2085_v14  ;;  %v2149_v17 = vld [vmem:[%s3174_s3 + $0xf8] sm:$0xf0]  ;;  %v2083_v18 = vld [vmem:[%s3174_s3 + $0x70] sm:$0xf]  ;;  %601 = vmatpush.bf16.msra.mxu2 %v1988_v11  ;;  %s3088_s12 = scalar_lea.vmem %s3181_s10, %s1944_s27 }
  0x12   : > { %v2283_v5 = vld [vmem:[%s2498_s26] sm:$0xff]  ;;  %650 = vmatpush.bf16.msra.mxu3 %v1992_v12  ;;  %v2152_v19 = vor.u32 %v2325_v15, %v2149_v17  ;;  %v2310_v20 = vld [vmem:[%s3174_s3 + $0x74] sm:$0xf0]  ;;  %v2147_v21 = vld [vmem:[%s3174_s3 + $0xf0] sm:$0xf] }
  0x13   : > { %v2326_v22 = vld [vmem:[%s3174_s3 + $0xf4] sm:$0xf0]  ;;  %1993 = vmatmul.msk.bf16.vlgmr.msra.gmra.mxu0 %vm471_vm0, %v2283_v5  ;;  %v2084_v23 = vor.u32 %v2310_v20, %v2083_v18  ;;  %v2307_v25 = vld [vmem:[%s3174_s3 + $0x64] sm:$0xf]  ;;  %v2077_v26 = vld [vmem:[%s3174_s3 + $0x68] sm:$0xf0] }
  0x14   : > { %v2148_v24 = vor.u32 %v2326_v22, %v2147_v21  ;;  %v2323_v27 = vld [vmem:[%s3174_s3 + $0xe4] sm:$0xf]  ;;  %2001 = vmatmul.msk.bf16.vlgmr.msra.gmra.mxu1 %vm471_vm0, %v2283_v5  ;;  %v2080_v28 = vor.u32 %v2307_v25, %v2077_v26  ;;  %v2141_v29 = vld [vmem:[%s3174_s3 + $0xe8] sm:$0xf0]  ;;  %v2075_v30 = vld [vmem:[%s3174_s3 + $0x60] sm:$0xf]  ;;  %2009 = vmatmul.msk.bf16.vlgmr.msra.gmra.mxu2 %vm471_vm0, %v2283_v5 }
  0x15   : > { %1084 = vmatpush.bf16.msrb.mxu2 %v2088_v16  ;;  %2017 = vmatmul.msk.bf16.vlgmr.msra.gmra.mxu3 %vm471_vm0, %v2283_v5  ;;  %v2144_v31 = vor.u32 %v2323_v27, %v2141_v29  ;;  %v2308_v32 = vld [vmem:[%s3174_s3 + $0x64] sm:$0xf0]  ;;  %v2139_v33 = vld [vmem:[%s3174_s3 + $0xe0] sm:$0xf]  ;;  %v2305_v37 = vld [vmem:[%s3174_s3 + $0x54] sm:$0xf] }
  0x16   : > { %1133 = vmatpush.bf16.msrb.mxu3 %v2152_v19  ;;  %v2324_v34 = vld [vmem:[%s3174_s3 + $0xe4] sm:$0xf0]  ;;  %986 = vmatpush.bf16.msrb.mxu0 %v2084_v23  ;;  %v2076_v35 = vor.u32 %v2308_v32, %v2075_v30  ;;  %v2069_v38 = vld [vmem:[%s3174_s3 + $0x58] sm:$0xf0]  ;;  %v2321_v39 = vld [vmem:[%s3174_s3 + $0xd4] sm:$0xf] }
  0x17   : > { %1035 = vmatpush.bf16.msrb.mxu1 %v2148_v24  ;;  %v2140_v36 = vor.u32 %v2324_v34, %v2139_v33  ;;  %v2072_v40 = vor.u32 %v2305_v37, %v2069_v38  ;;  %v2133_v41 = vld [vmem:[%s3174_s3 + $0xd8] sm:$0xf0]  ;;  %v2284_v43 = vld [vmem:[%s2498_s26 + $0x8] sm:$0xff]  ;;  %v2067_v44 = vld [vmem:[%s3174_s3 + $0x50] sm:$0xf] }
  0x18   : > { %v2136_v42 = vor.u32 %v2321_v39, %v2133_v41  ;;  %v2306_v45 = vld [vmem:[%s3174_s3 + $0x54] sm:$0xf0]  ;;  %v2131_v47 = vld [vmem:[%s3174_s3 + $0xd0] sm:$0xf]  ;;  %v2303_v49 = vld [vmem:[%s3174_s3 + $0x44] sm:$0xf] }
  0x19   : > { %1085 = vmatpush.bf16.msrb.mxu2 %v2080_v28  ;;  %v2068_v46 = vor.u32 %v2306_v45, %v2067_v44  ;;  %v2322_v48 = vld [vmem:[%s3174_s3 + $0xd4] sm:$0xf0]  ;;  %v2061_v51 = vld [vmem:[%s3174_s3 + $0x48] sm:$0xf0]  ;;  %v2319_v52 = vld [vmem:[%s3174_s3 + $0xc4] sm:$0xf] }
  0x1a   : > { %1134 = vmatpush.bf16.msrb.mxu3 %v2144_v31  ;;  %987 = vmatpush.bf16.msrb.mxu0 %v2076_v35  ;;  %v2132_v50 = vor.u32 %v2322_v48, %v2131_v47  ;;  %v2125_v53 = vld [vmem:[%s3174_s3 + $0xc8] sm:$0xf0]  ;;  %v2064_v54 = vor.u32 %v2303_v49, %v2061_v51  ;;  %v2285_v56 = vld [vmem:[%s2498_s26 + $0x10] sm:$0xff]  ;;  %v2059_v57 = vld [vmem:[%s3174_s3 + $0x40] sm:$0xf] }
  0x1b   : > { %1036 = vmatpush.bf16.msrb.mxu1 %v2140_v36  ;;  %v2128_v55 = vor.u32 %v2319_v52, %v2125_v53  ;;  %v2304_v58 = vld [vmem:[%s3174_s3 + $0x44] sm:$0xf0]  ;;  %v2123_v60 = vld [vmem:[%s3174_s3 + $0xc0] sm:$0xf]  ;;  %v2301_v62 = vld [vmem:[%s3174_s3 + $0x34] sm:$0xf] }
  0x1c   : > { %v2060_v59 = vor.u32 %v2304_v58, %v2059_v57  ;;  %v2320_v61 = vld [vmem:[%s3174_s3 + $0xc4] sm:$0xf0]  ;;  %v2053_v0 = vld [vmem:[%s3174_s3 + $0x38] sm:$0xf0]  ;;  %v2317_v1 = vld [vmem:[%s3174_s3 + $0xb4] sm:$0xf] }
  0x1d   : > { %1086 = vmatpush.bf16.msrb.mxu2 %v2072_v40  ;;  %v2124_v63 = vor.u32 %v2320_v61, %v2123_v60  ;;  %v2117_v2 = vld [vmem:[%s3174_s3 + $0xb8] sm:$0xf0]  ;;  %v2056_v3 = vor.u32 %v2301_v62, %v2053_v0  ;;  %v2051_v6 = vld [vmem:[%s3174_s3 + $0x30] sm:$0xf]  ;;  %v2302_v7 = vld [vmem:[%s3174_s3 + $0x34] sm:$0xf0] }
  0x1e   : > { %1135 = vmatpush.bf16.msrb.mxu3 %v2136_v42  ;;  %988 = vmatpush.bf16.msrb.mxu0 %v2068_v46  ;;  %v2120_v4 = vor.u32 %v2317_v1, %v2117_v2  ;;  %v2286_v5 = vld [vmem:[%s2498_s26 + $0x18] sm:$0xff]  ;;  %v2052_v8 = vor.u32 %v2302_v7, %v2051_v6  ;;  %v2115_v9 = vld [vmem:[%s3174_s3 + $0xb0] sm:$0xf]  ;;  %v2299_v11 = vld [vmem:[%s3174_s3 + $0x24] sm:$0xf] }
  0x1f   : > { %1037 = vmatpush.bf16.msrb.mxu1 %v2132_v50  ;;  %v2318_v10 = vld [vmem:[%s3174_s3 + $0xb4] sm:$0xf0]  ;;  %v2045_v13 = vld [vmem:[%s3174_s3 + $0x28] sm:$0xf0]  ;;  %v2315_v14 = vld [vmem:[%s3174_s3 + $0xa4] sm:$0xf] }
  0x20   : > { %v2116_v12 = vor.u32 %v2318_v10, %v2115_v9  ;;  %v2109_v15 = vld [vmem:[%s3174_s3 + $0xa8] sm:$0xf0]  ;;  %v2048_v16 = vor.u32 %v2299_v11, %v2045_v13  ;;  %v2287_v18 = vld [vmem:[%s2498_s26 + $0x20] sm:$0xff]  ;;  %v2300_v20 = vld [vmem:[%s3174_s3 + $0x24] sm:$0xf0] }
  0x21   : > { %1087 = vmatpush.bf16.msrb.mxu2 %v2064_v54  ;;  %v2112_v17 = vor.u32 %v2315_v14, %v2109_v15  ;;  %v2043_v19 = vld [vmem:[%s3174_s3 + $0x20] sm:$0xf]  ;;  %v2316_v23 = vld [vmem:[%s3174_s3 + $0xa4] sm:$0xf0]  ;;  %v2297_v24 = vld [vmem:[%s3174_s3 + $0x14] sm:$0xf] }
  0x22   : > { %1136 = vmatpush.bf16.msrb.mxu3 %v2128_v55  ;;  %989 = vmatpush.bf16.msrb.mxu0 %v2060_v59  ;;  %v2044_v21 = vor.u32 %v2300_v20, %v2043_v19  ;;  %v2107_v22 = vld [vmem:[%s3174_s3 + $0xa0] sm:$0xf]  ;;  %v2037_v26 = vld [vmem:[%s3174_s3 + $0x18] sm:$0xf0]  ;;  %v2313_v27 = vld [vmem:[%s3174_s3 + $0x94] sm:$0xf] }
  0x23   : > { %1994 = vmatmul.msk.bf16.gmra.mxu0 %vm471_vm0, %v2284_v43  ;;  %1038 = vmatpush.bf16.msrb.mxu1 %v2124_v63  ;;  %v2108_v25 = vor.u32 %v2316_v23, %v2107_v22  ;;  %v2101_v28 = vld [vmem:[%s3174_s3 + $0x98] sm:$0xf0]  ;;  %v2040_v29 = vor.u32 %v2297_v24, %v2037_v26  ;;  %v2288_v31 = vld [vmem:[%s2498_s26 + $0x28] sm:$0xff]  ;;  %v2035_v32 = vld [vmem:[%s3174_s3 + $0x10] sm:$0xf] }
  0x24   : > { %2002 = vmatmul.msk.bf16.gmra.mxu1 %vm471_vm0, %v2284_v43  ;;  %2010 = vmatmul.msk.bf16.gmra.mxu2 %vm471_vm0, %v2284_v43  ;;  %v2104_v30 = vor.u32 %v2313_v27, %v2101_v28  ;;  %v2298_v33 = vld [vmem:[%s3174_s3 + $0x14] sm:$0xf0]  ;;  %v2099_v35 = vld [vmem:[%s3174_s3 + $0x90] sm:$0xf]  ;;  %v2295_v37 = vld [vmem:[%s3174_s3 + $0x4] sm:$0xf] }
  0x25   : > { %2018 = vmatmul.msk.bf16.gmra.mxu3 %vm471_vm0, %v2284_v43  ;;  %1088 = vmatpush.bf16.msrb.mxu2 %v2056_v3  ;;  %v2036_v34 = vor.u32 %v2298_v33, %v2035_v32  ;;  %v2314_v36 = vld [vmem:[%s3174_s3 + $0x94] sm:$0xf0]  ;;  %v2029_v39 = vld [vmem:[%s3174_s3 + $0x8] sm:$0xf0]  ;;  %v2289_v41 = vld [vmem:[%s2498_s26 + $0x30] sm:$0xff] }
  0x26   : > { %1137 = vmatpush.bf16.msrb.mxu3 %v2120_v4  ;;  %990 = vmatpush.bf16.msrb.mxu0 %v2052_v8  ;;  %v2100_v38 = vor.u32 %v2314_v36, %v2099_v35  ;;  %v2032_v40 = vor.u32 %v2295_v37, %v2029_v39  ;;  %v2311_v42 = vld [vmem:[%s3174_s3 + $0x84] sm:$0xf]  ;;  %v2093_v43 = vld [vmem:[%s3174_s3 + $0x88] sm:$0xf0]  ;;  %v2027_v44 = vld [vmem:[%s3174_s3] sm:$0xf] }
  0x27   : > { %1039 = vmatpush.bf16.msrb.mxu1 %v2116_v12  ;;  %v2096_v45 = vor.u32 %v2311_v42, %v2093_v43  ;;  %v2296_v46 = vld [vmem:[%s3174_s3 + $0x4] sm:$0xf0]  ;;  %v2091_v47 = vld [vmem:[%s3174_s3 + $0x80] sm:$0xf]  ;;  %v2290_v51 = vld [vmem:[%s2498_s26 + $0x38] sm:$0xff] }
  0x28   : > { %v2312_v48 = vld [vmem:[%s3174_s3 + $0x84] sm:$0xf0]  ;;  %v2028_v49 = vor.u32 %v2296_v46, %v2027_v44  ;;  %v2341_v52 = vld [vmem:[#allocation2 + $0x74] sm:$0xf]  ;;  %v2213_v53 = vld [vmem:[#allocation2 + $0x78] sm:$0xf0] }
  0x29   : > { %1089 = vmatpush.bf16.msrb.mxu2 %v2048_v16  ;;  %v2092_v50 = vor.u32 %v2312_v48, %v2091_v47  ;;  %v2216_v54 = vor.u32 %v2341_v52, %v2213_v53  ;;  %v2357_v55 = vld [vmem:[#allocation2 + $0xf4] sm:$0xf]  ;;  %v2211_v58 = vld [vmem:[#allocation2 + $0x70] sm:$0xf]  ;;  %v2342_v59 = vld [vmem:[#allocation2 + $0x74] sm:$0xf0] }
  0x2a   : > { %1138 = vmatpush.bf16.msrb.mxu3 %v2112_v17  ;;  %991 = vmatpush.bf16.msrb.mxu0 %v2044_v21  ;;  %v2275_v60 = vld [vmem:[#allocation2 + $0xf0] sm:$0xf]  ;;  %v2212_v61 = vor.u32 %v2342_v59, %v2211_v58  ;;  %v2358_v62 = vld [vmem:[#allocation2 + $0xf4] sm:$0xf0]  ;;  %v401_v0 = vld [vmem:[%s3173_s2] sm:$0xf] }
  0x2b   : > { %1040 = vmatpush.bf16.msrb.mxu1 %v2108_v25  ;;  %v2276_v63 = vor.u32 %v2358_v62, %v2275_v60  ;;  %v2339_v2 = vld [vmem:[#allocation2 + $0x64] sm:$0xf]  ;;  %v2205_v3 = vld [vmem:[#allocation2 + $0x68] sm:$0xf0]  ;;  %v2759_v6 = vperm.slane %v401_v0, 0  ;;  %v2761_v7 = vperm.slane %v401_v0, 1 }
  0x2c   : > { %v2355_v8 = vld [vmem:[#allocation2 + $0xe4] sm:$0xf]  ;;  %v2269_v9 = vld [vmem:[#allocation2 + $0xe8] sm:$0xf0]  ;;  %v2203_v11 = vld [vmem:[#allocation2 + $0x60] sm:$0xf] }
  0x2d   : > { %1090 = vmatpush.bf16.msrb.mxu2 %v2040_v29  ;;  %v2272_v10 = vor.u32 %v2355_v8, %v2269_v9  ;;  %v2340_v12 = vld [vmem:[#allocation2 + $0x64] sm:$0xf0]  ;;  %v2267_v13 = vld [vmem:[#allocation2 + $0xe0] sm:$0xf]  ;;  %v2766_v23 = vperm.slane %v401_v0, 2  ;;  %v2769_v26 = vperm.slane %v401_v0, 3 }
  0x2e   : > { %1139 = vmatpush.bf16.msrb.mxu3 %v2104_v30  ;;  %992 = vmatpush.bf16.msrb.mxu0 %v2036_v34  ;;  %v2204_v14 = vor.u32 %v2340_v12, %v2203_v11  ;;  %v2356_v15 = vld [vmem:[#allocation2 + $0xe4] sm:$0xf0]  ;;  %v2337_v37 = vld [vmem:[#allocation2 + $0x54] sm:$0xf]  ;;  %v2195_v52 = vld [vmem:[#allocation2 + $0x50] sm:$0xf] }
  0x2f   : > { %1041 = vmatpush.bf16.msrb.mxu1 %v2100_v38  ;;  %v2268_v17 = vor.u32 %v2356_v15, %v2267_v13  ;;  %v2197_v38 = vld [vmem:[#allocation2 + $0x58] sm:$0xf0]  ;;  %v2353_v48 = vld [vmem:[#allocation2 + $0xd4] sm:$0xf]  ;;  %v2338_v53 = vld [vmem:[#allocation2 + $0x54] sm:$0xf0] }
  0x30   : > { %v2200_v43 = vor.u32 %v2337_v37, %v2197_v38  ;;  %v2335_v15 = vld [vmem:[#allocation2 + $0x44] sm:$0xf] }
  0x31   : > { %1091 = vmatpush.bf16.msrb.mxu2 %v2032_v40 }
  0x32   : > { %1140 = vmatpush.bf16.msrb.mxu3 %v2096_v45  ;;  %993 = vmatpush.bf16.msrb.mxu0 %v2028_v49  ;;  %v2261_v49 = vld [vmem:[#allocation2 + $0xd8] sm:$0xf0] }
  0x33   : > { %1995 = vmatmul.msk.bf16.gmra.mxu0 %vm471_vm0, %v2285_v56  ;;  %1042 = vmatpush.bf16.msrb.mxu1 %v2092_v50 }
  0x34   : > { %2003 = vmatmul.msk.bf16.gmra.mxu1 %vm471_vm0, %v2285_v56  ;;  %2011 = vmatmul.msk.bf16.gmra.mxu2 %vm471_vm0, %v2285_v56 }
  0x35   : > { %2019 = vmatmul.msk.bf16.gmra.mxu3 %vm471_vm0, %v2285_v56  ;;  %1510 = vmatpush.bf16.msra.mxu2 %v2216_v54  ;;  %v2277_v56 = vld [vmem:[#allocation2 + $0xf8] sm:$0xf0]  ;;  %v2259_v54 = vld [vmem:[#allocation2 + $0xd0] sm:$0xf] }
  0x36   : > { %v2280_v57 = vor.u32 %v2357_v55, %v2277_v56  ;;  %1412 = vmatpush.bf16.msra.mxu0 %v2212_v61  ;;  %v2196_v56 = vor.u32 %v2338_v53, %v2195_v52 }
  0x37   : > { %1461 = vmatpush.bf16.msra.mxu1 %v2276_v63 }
  0x38   : > { %1559 = vmatpush.bf16.msra.mxu3 %v2280_v57  ;;  %v2354_v57 = vld [vmem:[#allocation2 + $0xd4] sm:$0xf0] }
  0x39   : > { %v2260_v59 = vor.u32 %v2354_v57, %v2259_v54 }
  0x3a   : > { %1413 = vmatpush.bf16.msra.mxu0 %v2204_v14 }
  0x3b   : > { %1462 = vmatpush.bf16.msra.mxu1 %v2268_v17 }
  0x3c   : > { %1560 = vmatpush.bf16.msra.mxu3 %v2272_v10 }
  0x3e   : > { %1414 = vmatpush.bf16.msra.mxu0 %v2196_v56 }
  0x3f   : > { %1463 = vmatpush.bf16.msra.mxu1 %v2260_v59  ;;  %v2333_v59 = vld [vmem:[#allocation2 + $0x34] sm:$0xf] }
  0x43   : > { %1996 = vmatmul.msk.bf16.gmra.mxu0 %vm471_vm0, %v2286_v5 }
  0x44   : > { %2004 = vmatmul.msk.bf16.gmra.mxu1 %vm471_vm0, %v2286_v5  ;;  %2012 = vmatmul.msk.bf16.gmra.mxu2 %vm471_vm0, %v2286_v5 }
  0x45   : > { %2020 = vmatmul.msk.bf16.gmra.mxu3 %vm471_vm0, %v2286_v5  ;;  %v2208_v5 = vor.u32 %v2339_v2, %v2205_v3 }
  0x47   : > { %1511 = vmatpush.bf16.msra.mxu2 %v2208_v5 }
  0x4b   : > { %1512 = vmatpush.bf16.msra.mxu2 %v2200_v43 }
  0x53   : > { %1997 = vmatmul.msk.bf16.gmra.mxu0 %vm471_vm0, %v2287_v18 }
  0x54   : > { %2005 = vmatmul.msk.bf16.gmra.mxu1 %vm471_vm0, %v2287_v18  ;;  %2013 = vmatmul.msk.bf16.gmra.mxu2 %vm471_vm0, %v2287_v18 }
  0x55   : > { %2021 = vmatmul.msk.bf16.gmra.mxu3 %vm471_vm0, %v2287_v18 }
  0x63   : > { %1998 = vmatmul.msk.bf16.gmra.mxu0 %vm471_vm0, %v2288_v31 }
  0x64   : > { %2006 = vmatmul.msk.bf16.gmra.mxu1 %vm471_vm0, %v2288_v31  ;;  %2014 = vmatmul.msk.bf16.gmra.mxu2 %vm471_vm0, %v2288_v31 }
  0x65   : > { %2022 = vmatmul.msk.bf16.gmra.mxu3 %vm471_vm0, %v2288_v31 }
  0x73   : > { %1999 = vmatmul.msk.bf16.gmra.mxu0 %vm471_vm0, %v2289_v41 }
  0x74   : > { %2007 = vmatmul.msk.bf16.gmra.mxu1 %vm471_vm0, %v2289_v41  ;;  %2015 = vmatmul.msk.bf16.gmra.mxu2 %vm471_vm0, %v2289_v41 }
  0x75   : > { %2023 = vmatmul.msk.bf16.gmra.mxu3 %vm471_vm0, %v2289_v41 }
  0x83   : > { %2000 = vmatmul.msk.bf16.gmra.mxu0 %vm471_vm0, %v2290_v51 }
  0x84   : > { %2008 = vmatmul.msk.bf16.gmra.mxu1 %vm471_vm0, %v2290_v51  ;;  %2016 = vmatmul.msk.bf16.gmra.mxu2 %vm471_vm0, %v2290_v51 }
  0x85   : > { %2024 = vmatmul.msk.bf16.gmra.mxu3 %vm471_vm0, %v2290_v51  ;;  %v2264_v51 = vor.u32 %v2353_v48, %v2261_v49 }
  0x87   : > { %1561 = vmatpush.bf16.msra.mxu3 %v2264_v51 }
  0x90   : > { %v505_v1 = vpop.f32.mrf.mxu0 }
  0x91   : > { %v554_v4 = vpop.f32.mrf.mxu1  ;;  %v506_v16 = vadd.f32 %v505_v1, %v2759_v6 }
  0x92   : > { %v555_v18 = vadd.f32 %v554_v4, %v2761_v7 }
  0x93   : > { %v692_v27 = vmax.f32 %v506_v16, 0.0  ;;  %v2189_v16 = vld [vmem:[#allocation2 + $0x48] sm:$0xf0] }
  0x94   : > { %v693_v29 = vmax.f32 %v555_v18, 0.0 }
  0x97   : > { %v603_v20 = vpop.f32.mrf.mxu2 }
  0x98   : > { %v507_v19 = vpop.f32.mrf.mxu0  ;;  %v652_v24 = vpop.f32.mrf.mxu3  ;;  %v604_v31 = vadd.f32 %v603_v20, %v2766_v23 }
  0x99   : > { %v508_v21 = vadd.f32 %v507_v19, %v2759_v6  ;;  %v556_v22 = vpop.f32.mrf.mxu1  ;;  %v653_v33 = vadd.f32 %v652_v24, %v2769_v26 }
  0x9a   : > { %v557_v25 = vadd.f32 %v556_v22, %v2761_v7  ;;  %v694_v39 = vmax.f32 %v604_v31, 0.0  ;;  %v2187_v31 = vld [vmem:[#allocation2 + $0x40] sm:$0xf] }
  0x9b   : > { %v696_v28 = vmax.f32 %v508_v21, 0.0  ;;  %v695_v44 = vmax.f32 %v653_v33, 0.0  ;;  %v2192_v21 = vor.u32 %v2335_v15, %v2189_v16  ;;  %v2251_v33 = vld [vmem:[#allocation2 + $0xc0] sm:$0xf]  ;;  %v2350_v16 = vld [vmem:[#allocation2 + $0xb4] sm:$0xf0] }
  0x9c   : > { %v697_v30 = vmax.f32 %v557_v25, 0.0 }
  0x9d   : > { %v756_v32 = vpack.c.bf16 %v696_v28, %v692_v27  ;;  %1513 = vmatpush.bf16.msra.mxu2 %v2192_v21  ;;  %v2351_v28 = vld [vmem:[#allocation2 + $0xc4] sm:$0xf] }
  0x9e   : > { %v757_v34 = vpack.c.bf16 %v697_v30, %v693_v29  ;;  %v2253_v29 = vld [vmem:[#allocation2 + $0xc8] sm:$0xf0] }
  0x9f   : > { %994 = vmatmul.bf16.vlgmr.msrb.gmra.mxu0 %v756_v32  ;;  %1092 = vmatmul.bf16.vlgmr.msrb.gmra.mxu2 %v756_v32  ;;  %v605_v36 = vpop.f32.mrf.mxu2  ;;  %v2256_v30 = vor.u32 %v2351_v28, %v2253_v29  ;;  %v2336_v32 = vld [vmem:[#allocation2 + $0x44] sm:$0xf0] }
  0xa0   : > { %1043 = vmatmul.bf16.vlgmr.msrb.gmra.mxu1 %v757_v34  ;;  %1141 = vmatmul.bf16.vlgmr.msrb.gmra.mxu3 %v757_v34  ;;  %v510_v35 = vpop.f32.mrf.mxu0  ;;  %v606_v41 = vadd.f32 %v605_v36, %v2766_v23  ;;  %v654_v42 = vpop.f32.mrf.mxu3  ;;  %v2352_v36 = vld [vmem:[#allocation2 + $0xc4] sm:$0xf0] }
  0xa1   : > { %v559_v40 = vpop.f32.mrf.mxu1  ;;  %v655_v45 = vadd.f32 %v654_v42, %v2769_v26  ;;  %v511_v58 = vadd.f32 %v510_v35, %v2759_v6  ;;  %v2188_v35 = vor.u32 %v2336_v32, %v2187_v31  ;;  %1562 = vmatpush.bf16.msra.mxu3 %v2256_v30 }
  0xa2   : > { %v698_v46 = vmax.f32 %v606_v41, 0.0  ;;  %v560_v60 = vadd.f32 %v559_v40, %v2761_v7 }
  0xa3   : > { %v699_v47 = vmax.f32 %v655_v45, 0.0  ;;  %v700_v3 = vmax.f32 %v511_v58, 0.0  ;;  %1415 = vmatpush.bf16.msra.mxu0 %v2188_v35 }
  0xa4   : > { %v2775_v50 = vpack.c.bf16 %v698_v46, %v694_v39  ;;  %v701_v5 = vmax.f32 %v560_v60, 0.0  ;;  %v2252_v39 = vor.u32 %v2352_v36, %v2251_v33  ;;  %v2181_v60 = vld [vmem:[#allocation2 + $0x38] sm:$0xf0] }
  0xa5   : > { %v2777_v55 = vpack.c.bf16 %v699_v47, %v695_v44 }
  0xa6   : > { %1464 = vmatpush.bf16.msra.mxu1 %v2252_v39 }
  0xa7   : > { %v608_v62 = vpop.f32.mrf.mxu2 }
  0xa8   : > { %v512_v61 = vpop.f32.mrf.mxu0  ;;  %v657_v1 = vpop.f32.mrf.mxu3  ;;  %v609_v9 = vadd.f32 %v608_v62, %v2766_v23 }
  0xa9   : > { %v513_v63 = vadd.f32 %v512_v61, %v2759_v6  ;;  %v561_v0 = vpop.f32.mrf.mxu1  ;;  %v658_v11 = vadd.f32 %v657_v1, %v2769_v26  ;;  %v2184_v1 = vor.u32 %v2333_v59, %v2181_v60  ;;  %v2235_v59 = vld [vmem:[#allocation2 + $0xa0] sm:$0xf] }
  0xaa   : > { %v562_v2 = vadd.f32 %v561_v0, %v2761_v7  ;;  %v702_v17 = vmax.f32 %v609_v9, 0.0  ;;  %v2245_v9 = vld [vmem:[#allocation2 + $0xb8] sm:$0xf0] }
  0xab   : > { %v704_v4 = vmax.f32 %v513_v63, 0.0  ;;  %v703_v22 = vmax.f32 %v658_v11, 0.0  ;;  %1514 = vmatpush.bf16.msra.mxu2 %v2184_v1  ;;  %v2179_v11 = vld [vmem:[#allocation2 + $0x30] sm:$0xf] }
  0xac   : > { %v705_v8 = vmax.f32 %v562_v2, 0.0 }
  0xad   : > { %v758_v10 = vpack.c.bf16 %v704_v4, %v700_v3 }
  0xae   : > { %v759_v12 = vpack.c.bf16 %v705_v8, %v701_v5  ;;  %v2349_v8 = vld [vmem:[#allocation2 + $0xb4] sm:$0xf] }
  0xaf   : > { %999 = vmatmul.bf16.gmra.mxu0 %v758_v10  ;;  %1097 = vmatmul.bf16.gmra.mxu2 %v758_v10  ;;  %v610_v14 = vpop.f32.mrf.mxu2  ;;  %v2248_v10 = vor.u32 %v2349_v8, %v2245_v9 }
  0xb0   : > { %1048 = vmatmul.bf16.gmra.mxu1 %v759_v12  ;;  %1146 = vmatmul.bf16.gmra.mxu3 %v759_v12  ;;  %v515_v13 = vpop.f32.mrf.mxu0  ;;  %v611_v19 = vadd.f32 %v610_v14, %v2766_v23  ;;  %v659_v20 = vpop.f32.mrf.mxu3  ;;  %v2334_v12 = vld [vmem:[#allocation2 + $0x34] sm:$0xf0] }
  0xb1   : > { %v564_v18 = vpop.f32.mrf.mxu1  ;;  %v660_v24 = vadd.f32 %v659_v20, %v2769_v26  ;;  %v516_v38 = vadd.f32 %v515_v13, %v2759_v6  ;;  %v2243_v13 = vld [vmem:[#allocation2 + $0xb0] sm:$0xf]  ;;  %v2180_v15 = vor.u32 %v2334_v12, %v2179_v11  ;;  %1563 = vmatpush.bf16.msra.mxu3 %v2248_v10 }
  0xb2   : > { %v706_v25 = vmax.f32 %v611_v19, 0.0  ;;  %v565_v40 = vadd.f32 %v564_v18, %v2761_v7  ;;  %v2244_v19 = vor.u32 %v2350_v16, %v2243_v13 }
  0xb3   : > { %v707_v27 = vmax.f32 %v660_v24, 0.0  ;;  %v708_v47 = vmax.f32 %v516_v38, 0.0  ;;  %1416 = vmatpush.bf16.msra.mxu0 %v2180_v15 }
  0xb4   : > { %v2787_v34 = vpack.c.bf16 %v706_v25, %v702_v17  ;;  %v709_v49 = vmax.f32 %v565_v40, 0.0  ;;  %1465 = vmatpush.bf16.msra.mxu1 %v2244_v19 }
  0xb5   : > { %v2789_v37 = vpack.c.bf16 %v707_v27, %v703_v22 }
  0xb7   : > { %v613_v42 = vpop.f32.mrf.mxu2 }
  0xb8   : > { %v517_v41 = vpop.f32.mrf.mxu0  ;;  %v662_v45 = vpop.f32.mrf.mxu3  ;;  %v614_v52 = vadd.f32 %v613_v42, %v2766_v23  ;;  %v2173_v42 = vld [vmem:[#allocation2 + $0x28] sm:$0xf0] }
  0xb9   : > { %v518_v43 = vadd.f32 %v517_v41, %v2759_v6  ;;  %v566_v44 = vpop.f32.mrf.mxu1  ;;  %v663_v54 = vadd.f32 %v662_v45, %v2769_v26  ;;  %v2331_v41 = vld [vmem:[#allocation2 + $0x24] sm:$0xf] }
  0xba   : > { %v567_v46 = vadd.f32 %v566_v44, %v2761_v7  ;;  %v710_v61 = vmax.f32 %v614_v52, 0.0 }
  0xbb   : > { %v712_v48 = vmax.f32 %v518_v43, 0.0  ;;  %v711_v2 = vmax.f32 %v663_v54, 0.0  ;;  %v2237_v54 = vld [vmem:[#allocation2 + $0xa8] sm:$0xf0] }
  0xbc   : > { %v713_v51 = vmax.f32 %v567_v46, 0.0 }
  0xbd   : > { %v760_v53 = vpack.c.bf16 %v712_v48, %v708_v47  ;;  %v2176_v47 = vor.u32 %v2331_v41, %v2173_v42  ;;  %v2163_v41 = vld [vmem:[#allocation2 + $0x10] sm:$0xf]  ;;  %v2330_v42 = vld [vmem:[#allocation2 + $0x14] sm:$0xf0] }
  0xbe   : > { %v761_v56 = vpack.c.bf16 %v713_v51, %v709_v49 }
  0xbf   : > { %1004 = vmatmul.bf16.gmra.mxu0 %v760_v53  ;;  %1102 = vmatmul.bf16.gmra.mxu2 %v760_v53  ;;  %v615_v58 = vpop.f32.mrf.mxu2  ;;  %v2347_v53 = vld [vmem:[#allocation2 + $0xa4] sm:$0xf] }
  0xc0   : > { %1053 = vmatmul.bf16.gmra.mxu1 %v761_v56  ;;  %1151 = vmatmul.bf16.gmra.mxu3 %v761_v56  ;;  %v520_v57 = vpop.f32.mrf.mxu0  ;;  %v616_v63 = vadd.f32 %v615_v58, %v2766_v23  ;;  %v664_v0 = vpop.f32.mrf.mxu3  ;;  %v2240_v56 = vor.u32 %v2347_v53, %v2237_v54  ;;  %v2332_v58 = vld [vmem:[#allocation2 + $0x24] sm:$0xf0] }
  0xc1   : > { %v569_v62 = vpop.f32.mrf.mxu1  ;;  %v665_v3 = vadd.f32 %v664_v0, %v2769_v26  ;;  %v521_v18 = vadd.f32 %v520_v57, %v2759_v6  ;;  %1515 = vmatpush.bf16.msra.mxu2 %v2176_v47  ;;  %v2171_v57 = vld [vmem:[#allocation2 + $0x20] sm:$0xf] }
  0xc2   : > { %v714_v4 = vmax.f32 %v616_v63, 0.0  ;;  %v570_v20 = vadd.f32 %v569_v62, %v2761_v7  ;;  %v2348_v62 = vld [vmem:[#allocation2 + $0xa4] sm:$0xf0]  ;;  %1564 = vmatpush.bf16.msra.mxu3 %v2240_v56 }
  0xc3   : > { %v715_v5 = vmax.f32 %v665_v3, 0.0  ;;  %v716_v29 = vmax.f32 %v521_v18, 0.0  ;;  %v2236_v1 = vor.u32 %v2348_v62, %v2235_v59 }
  0xc4   : > { %v2799_v14 = vpack.c.bf16 %v714_v4, %v710_v61  ;;  %v717_v31 = vmax.f32 %v570_v20, 0.0  ;;  %v2172_v61 = vor.u32 %v2332_v58, %v2171_v57 }
  0xc5   : > { %v2801_v17 = vpack.c.bf16 %v715_v5, %v711_v2  ;;  %1466 = vmatpush.bf16.msra.mxu1 %v2236_v1 }
  0xc6   : > { %1417 = vmatpush.bf16.msra.mxu0 %v2172_v61 }
  0xc7   : > { %v618_v22 = vpop.f32.mrf.mxu2 }
  0xc8   : > { %v522_v21 = vpop.f32.mrf.mxu0  ;;  %v667_v27 = vpop.f32.mrf.mxu3  ;;  %v619_v33 = vadd.f32 %v618_v22, %v2766_v23 }
  0xc9   : > { %v523_v24 = vadd.f32 %v522_v21, %v2759_v6  ;;  %v571_v25 = vpop.f32.mrf.mxu1  ;;  %v668_v36 = vadd.f32 %v667_v27, %v2769_v26 }
  0xca   : > { %v572_v28 = vadd.f32 %v571_v25, %v2761_v7  ;;  %v718_v43 = vmax.f32 %v619_v33, 0.0  ;;  %v2165_v25 = vld [vmem:[#allocation2 + $0x18] sm:$0xf0] }
  0xcb   : > { %v720_v30 = vmax.f32 %v523_v24, 0.0  ;;  %v719_v48 = vmax.f32 %v668_v36, 0.0  ;;  %v2329_v24 = vld [vmem:[#allocation2 + $0x14] sm:$0xf] }
  0xcc   : > { %v721_v32 = vmax.f32 %v572_v28, 0.0 }
  0xcd   : > { %v762_v35 = vpack.c.bf16 %v720_v30, %v716_v29 }
  0xce   : > { %v763_v38 = vpack.c.bf16 %v721_v32, %v717_v31  ;;  %v2168_v31 = vor.u32 %v2329_v24, %v2165_v25 }
  0xcf   : > { %1009 = vmatmul.bf16.gmra.mxu0 %v762_v35  ;;  %1107 = vmatmul.bf16.gmra.mxu2 %v762_v35  ;;  %v620_v40 = vpop.f32.mrf.mxu2 }
  0xd0   : > { %1058 = vmatmul.bf16.gmra.mxu1 %v763_v38  ;;  %1156 = vmatmul.bf16.gmra.mxu3 %v763_v38  ;;  %v525_v39 = vpop.f32.mrf.mxu0  ;;  %v621_v45 = vadd.f32 %v620_v40, %v2766_v23  ;;  %v669_v46 = vpop.f32.mrf.mxu3  ;;  %v2345_v38 = vld [vmem:[#allocation2 + $0x94] sm:$0xf] }
  0xd1   : > { %v574_v44 = vpop.f32.mrf.mxu1  ;;  %v670_v49 = vadd.f32 %v669_v46, %v2769_v26  ;;  %v526_v0 = vadd.f32 %v525_v39, %v2759_v6  ;;  %1516 = vmatpush.bf16.msra.mxu2 %v2168_v31  ;;  %v2229_v39 = vld [vmem:[#allocation2 + $0x98] sm:$0xf0]  ;;  %v2346_v46 = vld [vmem:[#allocation2 + $0x94] sm:$0xf0]  ;;  %v2344_v31 = vld [vmem:[#allocation2 + $0x84] sm:$0xf0] }
  0xd2   : > { %v722_v51 = vmax.f32 %v621_v45, 0.0  ;;  %v575_v2 = vadd.f32 %v574_v44, %v2761_v7  ;;  %v2232_v40 = vor.u32 %v2345_v38, %v2229_v39  ;;  %v2164_v45 = vor.u32 %v2330_v42, %v2163_v41 }
  0xd3   : > { %v723_v52 = vmax.f32 %v670_v49, 0.0  ;;  %v724_v11 = vmax.f32 %v526_v0, 0.0 }
  0xd4   : > { %v2811_v60 = vpack.c.bf16 %v722_v51, %v718_v43  ;;  %v725_v13 = vmax.f32 %v575_v2, 0.0  ;;  %v2227_v43 = vld [vmem:[#allocation2 + $0x90] sm:$0xf]  ;;  %1565 = vmatpush.bf16.msra.mxu3 %v2232_v40  ;;  %1418 = vmatpush.bf16.msra.mxu0 %v2164_v45 }
  0xd5   : > { %v2813_v63 = vpack.c.bf16 %v723_v52, %v719_v48  ;;  %v2228_v49 = vor.u32 %v2346_v46, %v2227_v43 }
  0xd7   : > { %v623_v4 = vpop.f32.mrf.mxu2  ;;  %1467 = vmatpush.bf16.msra.mxu1 %v2228_v49 }
  0xd8   : > { %v527_v3 = vpop.f32.mrf.mxu0  ;;  %v672_v9 = vpop.f32.mrf.mxu3  ;;  %v624_v16 = vadd.f32 %v623_v4, %v2766_v23 }
  0xd9   : > { %v528_v5 = vadd.f32 %v527_v3, %v2759_v6  ;;  %v576_v8 = vpop.f32.mrf.mxu1  ;;  %v673_v19 = vadd.f32 %v672_v9, %v2769_v26  ;;  %v2327_v9 = vld [vmem:[#allocation2 + $0x4] sm:$0xf] }
  0xda   : > { %v577_v10 = vadd.f32 %v576_v8, %v2761_v7  ;;  %v726_v27 = vmax.f32 %v624_v16, 0.0 }
  0xdb   : > { %v728_v12 = vmax.f32 %v528_v5, 0.0  ;;  %v727_v32 = vmax.f32 %v673_v19, 0.0  ;;  %v2221_v19 = vld [vmem:[#allocation2 + $0x88] sm:$0xf0] }
  0xdc   : > { %v729_v15 = vmax.f32 %v577_v10, 0.0  ;;  %v2157_v10 = vld [vmem:[#allocation2 + $0x8] sm:$0xf0] }
  0xdd   : > { %v764_v18 = vpack.c.bf16 %v728_v12, %v724_v11  ;;  %v2343_v11 = vld [vmem:[#allocation2 + $0x84] sm:$0xf] }
  0xde   : > { %v765_v20 = vpack.c.bf16 %v729_v15, %v725_v13 }
  0xdf   : > { %1014 = vmatmul.bf16.gmra.mxu0 %v764_v18  ;;  %1112 = vmatmul.bf16.gmra.mxu2 %v764_v18  ;;  %v625_v22 = vpop.f32.mrf.mxu2  ;;  %v2160_v18 = vor.u32 %v2327_v9, %v2157_v10 }
  0xe0   : > { %1063 = vmatmul.bf16.gmra.mxu1 %v765_v20  ;;  %1161 = vmatmul.bf16.gmra.mxu3 %v765_v20  ;;  %v530_v21 = vpop.f32.mrf.mxu0  ;;  %v626_v29 = vadd.f32 %v625_v22, %v2766_v23  ;;  %v674_v30 = vpop.f32.mrf.mxu3  ;;  %v2224_v22 = vor.u32 %v2343_v11, %v2221_v19 }
  0xe1   : > { %v579_v28 = vpop.f32.mrf.mxu1  ;;  %v675_v33 = vadd.f32 %v674_v30, %v2769_v26  ;;  %v531_v48 = vadd.f32 %v530_v21, %v2759_v6  ;;  %1517 = vmatpush.bf16.msra.mxu2 %v2160_v18  ;;  %v2219_v30 = vld [vmem:[#allocation2 + $0x80] sm:$0xf] }
  0xe2   : > { %v730_v35 = vmax.f32 %v626_v29, 0.0  ;;  %v580_v51 = vadd.f32 %v579_v28, %v2761_v7  ;;  %1566 = vmatpush.bf16.msra.mxu3 %v2224_v22  ;;  %v2328_v28 = vld [vmem:[#allocation2 + $0x4] sm:$0xf0] }
  0xe3   : > { %v731_v36 = vmax.f32 %v675_v33, 0.0  ;;  %v732_v59 = vmax.f32 %v531_v48, 0.0  ;;  %v2220_v33 = vor.u32 %v2344_v31, %v2219_v30 }
  0xe4   : > { %v2823_v44 = vpack.c.bf16 %v730_v35, %v726_v27  ;;  %v733_v62 = vmax.f32 %v580_v51, 0.0  ;;  %v2155_v27 = vld [vmem:[#allocation2] sm:$0xf] }
  0xe5   : > { %v2825_v47 = vpack.c.bf16 %v731_v36, %v727_v32  ;;  %v2156_v29 = vor.u32 %v2328_v28, %v2155_v27  ;;  %1468 = vmatpush.bf16.msra.mxu1 %v2220_v33 }
  0xe7   : > { %v628_v53 = vpop.f32.mrf.mxu2  ;;  %1419 = vmatpush.bf16.msra.mxu0 %v2156_v29 }
  0xe8   : > { %v532_v52 = vpop.f32.mrf.mxu0  ;;  %v677_v57 = vpop.f32.mrf.mxu3  ;;  %v629_v1 = vadd.f32 %v628_v53, %v2766_v23 }
  0xe9   : > { %v533_v54 = vadd.f32 %v532_v52, %v2759_v6  ;;  %v581_v56 = vpop.f32.mrf.mxu1  ;;  %v678_v3 = vadd.f32 %v677_v57, %v2769_v26 }
  0xea   : > { %v582_v58 = vadd.f32 %v581_v56, %v2761_v7  ;;  %v734_v12 = vmax.f32 %v629_v1, 0.0 }
  0xeb   : > { %v736_v61 = vmax.f32 %v533_v54, 0.0  ;;  %v735_v20 = vmax.f32 %v678_v3, 0.0 }
  0xec   : > { %v737_v0 = vmax.f32 %v582_v58, 0.0 }
  0xed   : > { %v766_v2 = vpack.c.bf16 %v736_v61, %v732_v59 }
  0xee   : > { %v767_v4 = vpack.c.bf16 %v737_v0, %v733_v62 }
  0xef   : > { %1019 = vmatmul.bf16.gmra.mxu0 %v766_v2  ;;  %1117 = vmatmul.bf16.gmra.mxu2 %v766_v2  ;;  %v630_v8 = vpop.f32.mrf.mxu2 }
  0xf0   : > { %1068 = vmatmul.bf16.gmra.mxu1 %v767_v4  ;;  %1166 = vmatmul.bf16.gmra.mxu3 %v767_v4  ;;  %v535_v5 = vpop.f32.mrf.mxu0  ;;  %v631_v15 = vadd.f32 %v630_v8, %v2766_v23  ;;  %v679_v16 = vpop.f32.mrf.mxu3 }
  0xf1   : > { %v584_v13 = vpop.f32.mrf.mxu1  ;;  %v680_v21 = vadd.f32 %v679_v16, %v2769_v26  ;;  %v536_v36 = vadd.f32 %v535_v5, %v2759_v6 }
  0xf2   : > { %v738_v24 = vmax.f32 %v631_v15, 0.0  ;;  %v585_v38 = vadd.f32 %v584_v13, %v2761_v7 }
  0xf3   : > { %v739_v25 = vmax.f32 %v680_v21, 0.0  ;;  %v740_v46 = vmax.f32 %v536_v36, 0.0 }
  0xf4   : > { %v2835_v32 = vpack.c.bf16 %v738_v24, %v734_v12  ;;  %v741_v49 = vmax.f32 %v585_v38, 0.0 }
  0xf5   : > { %v2837_v35 = vpack.c.bf16 %v739_v25, %v735_v20 }
  0xf7   : > { %v633_v40 = vpop.f32.mrf.mxu2 }
  0xf8   : > { %v537_v39 = vpop.f32.mrf.mxu0  ;;  %v682_v43 = vpop.f32.mrf.mxu3  ;;  %v634_v52 = vadd.f32 %v633_v40, %v2766_v23  ;;  %v820_v40 = vld [vmem:[%s3175_s4] sm:$0x3] }
  0xf9   : > { %v538_v41 = vadd.f32 %v537_v39, %v2759_v6  ;;  %v586_v42 = vpop.f32.mrf.mxu1  ;;  %v683_v54 = vadd.f32 %v682_v43, %v2769_v26 }
  0xfa   : > { %v587_v45 = vadd.f32 %v586_v42, %v2761_v7  ;;  %v742_v59 = vmax.f32 %v634_v52, 0.0  ;;  %v2866_v42 = vperm.slane %v820_v40, 0 }
  0xfb   : > { %v744_v48 = vmax.f32 %v538_v41, 0.0  ;;  %v743_v1 = vmax.f32 %v683_v54, 0.0 }
  0xfc   : > { %v745_v51 = vmax.f32 %v587_v45, 0.0 }
  0xfd   : > { %v768_v53 = vpack.c.bf16 %v744_v48, %v740_v46  ;;  %v1640_v48 = vld [vmem:[%s3178_s7] sm:$0x3] }
  0xfe   : > { %v769_v56 = vpack.c.bf16 %v745_v51, %v741_v49  ;;  %v2879_v54 = vperm.slane %v1640_v48, 0 }
  0xff   : > { %1024 = vmatmul.bf16.gmra.mxu0 %v768_v53  ;;  %1122 = vmatmul.bf16.gmra.mxu2 %v768_v53  ;;  %v635_v58 = vpop.f32.mrf.mxu2 }
 0x100   : > { %1073 = vmatmul.bf16.gmra.mxu1 %v769_v56  ;;  %1171 = vmatmul.bf16.gmra.mxu3 %v769_v56  ;;  %v540_v57 = vpop.f32.mrf.mxu0  ;;  %v636_v62 = vadd.f32 %v635_v58, %v2766_v23  ;;  %v684_v0 = vpop.f32.mrf.mxu3 }
 0x101   : > { %v589_v61 = vpop.f32.mrf.mxu1  ;;  %v685_v2 = vadd.f32 %v684_v0, %v2769_v26  ;;  %v541_v9 = vadd.f32 %v540_v57, %v2759_v6 }
 0x102   : > { %v746_v3 = vmax.f32 %v636_v62, 0.0  ;;  %v590_v10 = vadd.f32 %v589_v61, %v2761_v7 }
 0x103   : > { %v747_v4 = vmax.f32 %v685_v2, 0.0  ;;  %v748_v19 = vmax.f32 %v541_v9, 0.0 }
 0x104   : > { %v2847_v5 = vpack.c.bf16 %v746_v3, %v742_v59  ;;  %v749_v21 = vmax.f32 %v590_v10, 0.0  ;;  %v2882_v59 = vperm.slane %v1640_v48, 1 }
 0x105   : > { %v2849_v8 = vpack.c.bf16 %v747_v4, %v743_v1 }
 0x107   : > { %v638_v12 = vpop.f32.mrf.mxu2 }
 0x108   : > { %v542_v11 = vpop.f32.mrf.mxu0  ;;  %v687_v16 = vpop.f32.mrf.mxu3  ;;  %v639_v24 = vadd.f32 %v638_v12, %v2766_v23 }
 0x109   : > { %v543_v13 = vadd.f32 %v542_v11, %v2759_v6  ;;  %v591_v15 = vpop.f32.mrf.mxu1  ;;  %v688_v27 = vadd.f32 %v687_v16, %v2769_v26 }
 0x10a   : > { %v592_v18 = vadd.f32 %v591_v15, %v2761_v7  ;;  %v750_v6 = vmax.f32 %v639_v24, 0.0 }
 0x10b   : > { %v752_v20 = vmax.f32 %v543_v13, 0.0  ;;  %v751_v7 = vmax.f32 %v688_v27, 0.0 }
 0x10c   : > { %v753_v22 = vmax.f32 %v592_v18, 0.0 }
 0x10d   : > { %v770_v25 = vpack.c.bf16 %v752_v20, %v748_v19 }
 0x10e   : > { %v771_v28 = vpack.c.bf16 %v753_v22, %v749_v21 }
 0x10f   : > { %1029 = vmatmul.bf16.gmra.mxu0 %v770_v25  ;;  %1127 = vmatmul.bf16.gmra.mxu2 %v770_v25  ;;  %v640_v29 = vpop.f32.mrf.mxu2 }
 0x110   : > { %1078 = vmatmul.bf16.gmra.mxu1 %v771_v28  ;;  %1176 = vmatmul.bf16.gmra.mxu3 %v771_v28  ;;  %v641_v30 = vadd.f32 %v640_v29, %v2766_v23  ;;  %v689_v31 = vpop.f32.mrf.mxu3 }
 0x111   : > { %v690_v33 = vadd.f32 %v689_v31, %v2769_v26  ;;  %v2871_v26 = vperm.slane %v820_v40, 1 }
 0x112   : > { %v754_v36 = vmax.f32 %v641_v30, 0.0 }
 0x113   : > { %v755_v38 = vmax.f32 %v690_v33, 0.0 }
 0x114   : > { %v2859_v39 = vpack.c.bf16 %v754_v36, %v750_v6 }
 0x115   : > { %v2864_v41 = vpack.c.bf16 %v755_v38, %v751_v7 }
 0x11c   : > { %v995_v43 = vpop.f32.mrf.mxu0 }
 0x11d   : > { %v996_v45 = vadd.f32 %v995_v43, %v2866_v42  ;;  %v1044_v23 = vpop.f32.mrf.mxu1 }
 0x11f   : > { %1420 = vmatmul.bf16.vlgmr.msra.gmra.mxu0 %v2775_v50  ;;  %1518 = vmatmul.bf16.vlgmr.msra.gmra.mxu2 %v2775_v50  ;;  %v1045_v46 = vadd.f32 %v1044_v23, %v996_v45 }
 0x120   : > { %1469 = vmatmul.bf16.vlgmr.msra.gmra.mxu1 %v2777_v55  ;;  %1567 = vmatmul.bf16.vlgmr.msra.gmra.mxu3 %v2777_v55 }
 0x121   : > { %v1182_v56 = vmax.f32 %v1045_v46, 0.0 }
 0x122   : > { %v1093_v49 = vpop.f32.mrf.mxu2 }
 0x123   : > { %v1094_v51 = vadd.f32 %v1093_v49, %v2871_v26  ;;  %v1142_v52 = vpop.f32.mrf.mxu3  ;;  %v1646_v62 = vmul.f32 %v2879_v54, %v1182_v56 }
 0x124   : > { %v997_v53 = vpop.f32.mrf.mxu0 }
 0x125   : > { %v1143_v50 = vadd.f32 %v1142_v52, %v1094_v51  ;;  %v998_v57 = vadd.f32 %v997_v53, %v2866_v42  ;;  %v1046_v58 = vpop.f32.mrf.mxu1 }
 0x127   : > { %v1183_v55 = vmax.f32 %v1143_v50, 0.0  ;;  %v1047_v61 = vadd.f32 %v1046_v58, %v998_v57 }
 0x129   : > { %v1647_v0 = vmul.f32 %v2882_v59, %v1183_v55  ;;  %v1184_v10 = vmax.f32 %v1047_v61, 0.0 }
 0x12a   : > { %v1095_v1 = vpop.f32.mrf.mxu2 }
 0x12b   : > { %v1096_v2 = vadd.f32 %v1095_v1, %v2871_v26  ;;  %v1144_v3 = vpop.f32.mrf.mxu3  ;;  %v1678_v4 = vadd.f32 %v1647_v0, %v1646_v62  ;;  %v1648_v18 = vmul.f32 %v2879_v54, %v1184_v10 }
 0x12c   : > { %v1000_v9 = vpop.f32.mrf.mxu0 }
 0x12d   : > { %v1145_v11 = vadd.f32 %v1144_v3, %v1096_v2  ;;  %v1001_v12 = vadd.f32 %v1000_v9, %v2866_v42  ;;  %v1049_v13 = vpop.f32.mrf.mxu1  ;;  %1679 = vadd.xlane.f32.xlu0 %v1678_v4 }
 0x12f   : > { %v1185_v15 = vmax.f32 %v1145_v11, 0.0  ;;  %1425 = vmatmul.bf16.gmra.mxu0 %v2787_v34  ;;  %1523 = vmatmul.bf16.gmra.mxu2 %v2787_v34  ;;  %v1050_v16 = vadd.f32 %v1049_v13, %v1001_v12 }
 0x130   : > { %1474 = vmatmul.bf16.gmra.mxu1 %v2789_v37  ;;  %1572 = vmatmul.bf16.gmra.mxu3 %v2789_v37 }
 0x131   : > { %v1649_v19 = vmul.f32 %v2882_v59, %v1185_v15  ;;  %v1186_v27 = vmax.f32 %v1050_v16, 0.0 }
 0x132   : > { %v1098_v20 = vpop.f32.mrf.mxu2 }
 0x133   : > { %v1099_v21 = vadd.f32 %v1098_v20, %v2871_v26  ;;  %v1147_v22 = vpop.f32.mrf.mxu3  ;;  %v1681_v24 = vadd.f32 %v1649_v19, %v1648_v18  ;;  %v1650_v37 = vmul.f32 %v2879_v54, %v1186_v27 }
 0x134   : > { %v1002_v25 = vpop.f32.mrf.mxu0 }
 0x135   : > { %v1148_v28 = vadd.f32 %v1147_v22, %v1099_v21  ;;  %v1003_v29 = vadd.f32 %v1002_v25, %v2866_v42  ;;  %v1051_v34 = vpop.f32.mrf.mxu1  ;;  %1682 = vadd.xlane.f32.xlu0 %v1681_v24 }
 0x137   : > { %v1187_v6 = vmax.f32 %v1148_v28, 0.0  ;;  %v1052_v30 = vadd.f32 %v1051_v34, %v1003_v29 }
 0x139   : > { %v1651_v31 = vmul.f32 %v2882_v59, %v1187_v6  ;;  %v1188_v43 = vmax.f32 %v1052_v30, 0.0 }
 0x13a   : > { %v1100_v7 = vpop.f32.mrf.mxu2 }
 0x13b   : > { %v1101_v33 = vadd.f32 %v1100_v7, %v2871_v26  ;;  %v1149_v36 = vpop.f32.mrf.mxu3  ;;  %v1684_v38 = vadd.f32 %v1651_v31, %v1650_v37  ;;  %v1652_v51 = vmul.f32 %v2879_v54, %v1188_v43 }
 0x13c   : > { %v1005_v40 = vpop.f32.mrf.mxu0 }
 0x13d   : > { %v1150_v45 = vadd.f32 %v1149_v36, %v1101_v33  ;;  %v1006_v23 = vadd.f32 %v1005_v40, %v2866_v42  ;;  %v1054_v46 = vpop.f32.mrf.mxu1  ;;  %1685 = vadd.xlane.f32.xlu1 %v1684_v38 }
 0x13f   : > { %v1189_v48 = vmax.f32 %v1150_v45, 0.0  ;;  %1430 = vmatmul.bf16.gmra.mxu0 %v2799_v14  ;;  %1528 = vmatmul.bf16.gmra.mxu2 %v2799_v14  ;;  %v1055_v49 = vadd.f32 %v1054_v46, %v1006_v23 }
 0x140   : > { %1479 = vmatmul.bf16.gmra.mxu1 %v2801_v17  ;;  %1577 = vmatmul.bf16.gmra.mxu3 %v2801_v17 }
 0x141   : > { %v1653_v52 = vmul.f32 %v2882_v59, %v1189_v48  ;;  %v1190_v55 = vmax.f32 %v1055_v49, 0.0 }
 0x142   : > { %v1103_v53 = vpop.f32.mrf.mxu2 }
 0x143   : > { %v1104_v56 = vadd.f32 %v1103_v53, %v2871_v26  ;;  %v1152_v50 = vpop.f32.mrf.mxu3  ;;  %v1687_v57 = vadd.f32 %v1653_v52, %v1652_v51  ;;  %v1654_v17 = vmul.f32 %v2879_v54, %v1190_v55 }
 0x144   : > { %v1007_v58 = vpop.f32.mrf.mxu0 }
 0x145   : > { %v1153_v61 = vadd.f32 %v1152_v50, %v1104_v56  ;;  %v1008_v62 = vadd.f32 %v1007_v58, %v2866_v42  ;;  %v1056_v14 = vpop.f32.mrf.mxu1  ;;  %1688 = vadd.xlane.f32.xlu1 %v1687_v57 }
 0x147   : > { %v1191_v0 = vmax.f32 %v1153_v61, 0.0  ;;  %v1057_v1 = vadd.f32 %v1056_v14, %v1008_v62 }
 0x149   : > { %v1655_v2 = vmul.f32 %v2882_v59, %v1191_v0  ;;  %v1192_v12 = vmax.f32 %v1057_v1, 0.0 }
 0x14a   : > { %v1105_v3 = vpop.f32.mrf.mxu2 }
 0x14b   : > { %v1106_v4 = vadd.f32 %v1105_v3, %v2871_v26  ;;  %v1154_v9 = vpop.f32.mrf.mxu3  ;;  %v1690_v10 = vadd.f32 %v1655_v2, %v1654_v17  ;;  %v1656_v20 = vmul.f32 %v2879_v54, %v1192_v12 }
 0x14c   : > { %v1010_v11 = vpop.f32.mrf.mxu0 }
 0x14d   : > { %v1155_v13 = vadd.f32 %v1154_v9, %v1106_v4  ;;  %v1011_v15 = vadd.f32 %v1010_v11, %v2866_v42  ;;  %v1059_v16 = vpop.f32.mrf.mxu1  ;;  %1691 = vadd.xlane.f32.xlu2 %v1690_v10 }
 0x14f   : > { %v1193_v18 = vmax.f32 %v1155_v13, 0.0  ;;  %1435 = vmatmul.bf16.gmra.mxu0 %v2811_v60  ;;  %1533 = vmatmul.bf16.gmra.mxu2 %v2811_v60  ;;  %v1060_v19 = vadd.f32 %v1059_v16, %v1011_v15 }
 0x150   : > { %1484 = vmatmul.bf16.gmra.mxu1 %v2813_v63  ;;  %1582 = vmatmul.bf16.gmra.mxu3 %v2813_v63 }
 0x151   : > { %v1657_v21 = vmul.f32 %v2882_v59, %v1193_v18  ;;  %v1194_v29 = vmax.f32 %v1060_v19, 0.0 }
 0x152   : > { %v1108_v22 = vpop.f32.mrf.mxu2 }
 0x153   : > { %v1109_v24 = vadd.f32 %v1108_v22, %v2871_v26  ;;  %v1157_v25 = vpop.f32.mrf.mxu3  ;;  %v1693_v27 = vadd.f32 %v1657_v21, %v1656_v20  ;;  %v1658_v63 = vmul.f32 %v2879_v54, %v1194_v29 }
 0x154   : > { %v1012_v28 = vpop.f32.mrf.mxu0 }
 0x155   : > { %v1158_v34 = vadd.f32 %v1157_v25, %v1109_v24  ;;  %v1013_v6 = vadd.f32 %v1012_v28, %v2866_v42  ;;  %v1061_v60 = vpop.f32.mrf.mxu1  ;;  %1694 = vadd.xlane.f32.xlu2 %v1693_v27 }
 0x157   : > { %v1195_v30 = vmax.f32 %v1158_v34, 0.0  ;;  %v1062_v31 = vadd.f32 %v1061_v60, %v1013_v6 }
 0x159   : > { %v1659_v37 = vmul.f32 %v2882_v59, %v1195_v30  ;;  %v1196_v43 = vmax.f32 %v1062_v31, 0.0 }
 0x15a   : > { %v1110_v7 = vpop.f32.mrf.mxu2 }
 0x15b   : > { %v1111_v33 = vadd.f32 %v1110_v7, %v2871_v26  ;;  %v1159_v36 = vpop.f32.mrf.mxu3  ;;  %v1696_v38 = vadd.f32 %v1659_v37, %v1658_v63  ;;  %v1660_v51 = vmul.f32 %v2879_v54, %v1196_v43 }
 0x15c   : > { %v1015_v40 = vpop.f32.mrf.mxu0 }
 0x15d   : > { %v1160_v45 = vadd.f32 %v1159_v36, %v1111_v33  ;;  %v1016_v23 = vadd.f32 %v1015_v40, %v2866_v42  ;;  %v1064_v46 = vpop.f32.mrf.mxu1  ;;  %1697 = vadd.xlane.f32.xlu0 %v1696_v38 }
 0x15f   : > { %v1197_v48 = vmax.f32 %v1160_v45, 0.0  ;;  %1440 = vmatmul.bf16.gmra.mxu0 %v2823_v44  ;;  %1538 = vmatmul.bf16.gmra.mxu2 %v2823_v44  ;;  %v1065_v49 = vadd.f32 %v1064_v46, %v1016_v23 }
 0x160   : > { %1489 = vmatmul.bf16.gmra.mxu1 %v2825_v47  ;;  %1587 = vmatmul.bf16.gmra.mxu3 %v2825_v47 }
 0x161   : > { %v1661_v52 = vmul.f32 %v2882_v59, %v1197_v48  ;;  %v1198_v55 = vmax.f32 %v1065_v49, 0.0 }
 0x162   : > { %v1113_v53 = vpop.f32.mrf.mxu2 }
 0x163   : > { %v1114_v56 = vadd.f32 %v1113_v53, %v2871_v26  ;;  %v1162_v50 = vpop.f32.mrf.mxu3  ;;  %v1699_v57 = vadd.f32 %v1661_v52, %v1660_v51  ;;  %v1662_v47 = vmul.f32 %v2879_v54, %v1198_v55 }
 0x164   : > { %v1017_v58 = vpop.f32.mrf.mxu0 }
 0x165   : > { %v1163_v61 = vadd.f32 %v1162_v50, %v1114_v56  ;;  %v1018_v62 = vadd.f32 %v1017_v58, %v2866_v42  ;;  %v1066_v44 = vpop.f32.mrf.mxu1  ;;  %1700 = vadd.xlane.f32.xlu1 %v1699_v57 }
 0x167   : > { %v1199_v14 = vmax.f32 %v1163_v61, 0.0  ;;  %v1067_v1 = vadd.f32 %v1066_v44, %v1018_v62 }
 0x169   : > { %v1663_v0 = vmul.f32 %v2882_v59, %v1199_v14  ;;  %v1200_v10 = vmax.f32 %v1067_v1, 0.0 }
 0x16a   : > { %v1115_v17 = vpop.f32.mrf.mxu2 }
 0x16b   : > { %v1116_v2 = vadd.f32 %v1115_v17, %v2871_v26  ;;  %v1164_v3 = vpop.f32.mrf.mxu3  ;;  %v1702_v4 = vadd.f32 %v1663_v0, %v1662_v47  ;;  %v1664_v16 = vmul.f32 %v2879_v54, %v1200_v10 }
 0x16c   : > { %v1020_v9 = vpop.f32.mrf.mxu0 }
 0x16d   : > { %v1165_v11 = vadd.f32 %v1164_v3, %v1116_v2  ;;  %v1021_v12 = vadd.f32 %v1020_v9, %v2866_v42  ;;  %v1069_v13 = vpop.f32.mrf.mxu1  ;;  %1703 = vadd.xlane.f32.xlu2 %v1702_v4 }
 0x16f   : > { %v1201_v15 = vmax.f32 %v1165_v11, 0.0  ;;  %1445 = vmatmul.bf16.gmra.mxu0 %v2835_v32  ;;  %1543 = vmatmul.bf16.gmra.mxu2 %v2835_v32  ;;  %v1070_v19 = vadd.f32 %v1069_v13, %v1021_v12 }
 0x170   : > { %1494 = vmatmul.bf16.gmra.mxu1 %v2837_v35  ;;  %1592 = vmatmul.bf16.gmra.mxu3 %v2837_v35 }
 0x171   : > { %v1665_v18 = vmul.f32 %v2882_v59, %v1201_v15  ;;  %v1202_v27 = vmax.f32 %v1070_v19, 0.0 }
 0x172   : > { %v1118_v20 = vpop.f32.mrf.mxu2 }
 0x173   : > { %v1119_v21 = vadd.f32 %v1118_v20, %v2871_v26  ;;  %v1167_v22 = vpop.f32.mrf.mxu3  ;;  %v1705_v24 = vadd.f32 %v1665_v18, %v1664_v16  ;;  %v1666_v35 = vmul.f32 %v2879_v54, %v1202_v27 }
 0x174   : > { %v1022_v25 = vpop.f32.mrf.mxu0 }
 0x175   : > { %v1168_v28 = vadd.f32 %v1167_v22, %v1119_v21  ;;  %v1023_v29 = vadd.f32 %v1022_v25, %v2866_v42  ;;  %v1071_v32 = vpop.f32.mrf.mxu1  ;;  %1706 = vadd.xlane.f32.xlu0 %v1705_v24 }
 0x177   : > { %v1203_v34 = vmax.f32 %v1168_v28, 0.0  ;;  %v1072_v60 = vadd.f32 %v1071_v32, %v1023_v29 }
 0x179   : > { %v1667_v6 = vmul.f32 %v2882_v59, %v1203_v34  ;;  %v1204_v33 = vmax.f32 %v1072_v60, 0.0 }
 0x17a   : > { %v1120_v30 = vpop.f32.mrf.mxu2 }
 0x17b   : > { %v1121_v63 = vadd.f32 %v1120_v30, %v2871_v26  ;;  %v1169_v37 = vpop.f32.mrf.mxu3  ;;  %v1708_v31 = vadd.f32 %v1667_v6, %v1666_v35  ;;  %v1668_v45 = vmul.f32 %v2879_v54, %v1204_v33 }
 0x17c   : > { %v1025_v7 = vpop.f32.mrf.mxu0 }
 0x17d   : > { %v1170_v36 = vadd.f32 %v1169_v37, %v1121_v63  ;;  %v1026_v38 = vadd.f32 %v1025_v7, %v2866_v42  ;;  %v1074_v40 = vpop.f32.mrf.mxu1  ;;  %1709 = vadd.xlane.f32.xlu1 %v1708_v31 }
 0x17f   : > { %v1205_v43 = vmax.f32 %v1170_v36, 0.0  ;;  %1450 = vmatmul.bf16.gmra.mxu0 %v2847_v5  ;;  %1548 = vmatmul.bf16.gmra.mxu2 %v2847_v5  ;;  %v1075_v46 = vadd.f32 %v1074_v40, %v1026_v38 }
 0x180   : > { %1499 = vmatmul.bf16.gmra.mxu1 %v2849_v8  ;;  %1597 = vmatmul.bf16.gmra.mxu3 %v2849_v8 }
 0x181   : > { %v1669_v23 = vmul.f32 %v2882_v59, %v1205_v43  ;;  %v1206_v56 = vmax.f32 %v1075_v46, 0.0 }
 0x182   : > { %v1123_v48 = vpop.f32.mrf.mxu2 }
 0x183   : > { %v1124_v49 = vadd.f32 %v1123_v48, %v2871_v26  ;;  %v1172_v51 = vpop.f32.mrf.mxu3  ;;  %v1711_v52 = vadd.f32 %v1669_v23, %v1668_v45  ;;  %v1670_v8 = vmul.f32 %v2879_v54, %v1206_v56 }
 0x184   : > { %v1027_v53 = vpop.f32.mrf.mxu0 }
 0x185   : > { %v1173_v50 = vadd.f32 %v1172_v51, %v1124_v49  ;;  %v1028_v57 = vadd.f32 %v1027_v53, %v2866_v42  ;;  %v1076_v5 = vpop.f32.mrf.mxu1  ;;  %1712 = vadd.xlane.f32.xlu2 %v1711_v52 }
 0x187   : > { %v1207_v58 = vmax.f32 %v1173_v50, 0.0  ;;  %v1077_v61 = vadd.f32 %v1076_v5, %v1028_v57 }
 0x189   : > { %v1671_v55 = vmul.f32 %v2882_v59, %v1207_v58  ;;  %v1208_v1 = vmax.f32 %v1077_v61, 0.0 }
 0x18a   : > { %v1125_v62 = vpop.f32.mrf.mxu2 }
 0x18b   : > { %v1126_v44 = vadd.f32 %v1125_v62, %v2871_v26  ;;  %v1174_v14 = vpop.f32.mrf.mxu3  ;;  %v1714_v47 = vadd.f32 %v1671_v55, %v1670_v8  ;;  %v1672_v9 = vmul.f32 %v2879_v54, %v1208_v1 }
 0x18c   : > { %v1030_v0 = vpop.f32.mrf.mxu0 }
 0x18d   : > { %v1175_v17 = vadd.f32 %v1174_v14, %v1126_v44  ;;  %v1031_v2 = vadd.f32 %v1030_v0, %v2866_v42  ;;  %v1079_v3 = vpop.f32.mrf.mxu1  ;;  %1715 = vadd.xlane.f32.xlu0 %v1714_v47 }
 0x18f   : > { %v1209_v4 = vmax.f32 %v1175_v17, 0.0  ;;  %1455 = vmatmul.bf16.gmra.mxu0 %v2859_v39  ;;  %1553 = vmatmul.bf16.gmra.mxu2 %v2859_v39  ;;  %v1080_v11 = vadd.f32 %v1079_v3, %v1031_v2 }
 0x190   : > { %1504 = vmatmul.bf16.gmra.mxu1 %v2864_v41  ;;  %1602 = vmatmul.bf16.gmra.mxu3 %v2864_v41  ;;  %v1246_v41 = vld [vmem:[%s3177_s6] sm:$0x3] }
 0x191   : > { %v1673_v10 = vmul.f32 %v2882_v59, %v1209_v4  ;;  %v1210_v19 = vmax.f32 %v1080_v11, 0.0  ;;  %v2973_v28 = vperm.slane %v1246_v41, 0  ;;  %v2977_v31 = vperm.slane %v1246_v41, 1 }
 0x192   : > { %v1128_v12 = vpop.f32.mrf.mxu2 }
 0x193   : > { %v1129_v13 = vadd.f32 %v1128_v12, %v2871_v26  ;;  %v1177_v15 = vpop.f32.mrf.mxu3  ;;  %v1717_v16 = vadd.f32 %v1673_v10, %v1672_v9  ;;  %v1674_v24 = vmul.f32 %v2879_v54, %v1210_v19 }
 0x194   : > { %v1032_v18 = vpop.f32.mrf.mxu0 }
 0x195   : > { %v1178_v20 = vadd.f32 %v1177_v15, %v1129_v13  ;;  %v1033_v21 = vadd.f32 %v1032_v18, %v2866_v42  ;;  %v1081_v39 = vpop.f32.mrf.mxu1  ;;  %1718 = vadd.xlane.f32.xlu1 %v1717_v16 }
 0x197   : > { %v1211_v22 = vmax.f32 %v1178_v20, 0.0  ;;  %v1082_v27 = vadd.f32 %v1081_v39, %v1033_v21 }
 0x199   : > { %v1675_v25 = vmul.f32 %v2882_v59, %v1211_v22  ;;  %v1212_v6 = vmax.f32 %v1082_v27, 0.0 }
 0x19a   : > { %v1130_v29 = vpop.f32.mrf.mxu2 }
 0x19b   : > { %v1131_v32 = vadd.f32 %v1130_v29, %v2871_v26  ;;  %v1179_v34 = vpop.f32.mrf.mxu3  ;;  %v1720_v35 = vadd.f32 %v1675_v25, %v1674_v24  ;;  %v1676_v7 = vmul.f32 %v2879_v54, %v1212_v6  ;;  %v1726_v26 = vld [vmem:[%s3179_s8] sm:$0x3] }
 0x19c   : > { %v1421_v42 = vpop.f32.mrf.mxu0  ;;  %v2985_v23 = vperm.slane %v1726_v26, 0  ;;  %v2987_v51 = vperm.slane %v1726_v26, 1 }
 0x19d   : > { %v1180_v60 = vadd.f32 %v1179_v34, %v1131_v32  ;;  %v1422_v30 = vadd.f32 %v1421_v42, %v2973_v28  ;;  %v1470_v63 = vpop.f32.mrf.mxu1  ;;  %1721 = vadd.xlane.f32.xlu2 %v1720_v35 }
 0x19f   : > { %v1213_v37 = vmax.f32 %v1180_v60, 0.0  ;;  %v1471_v36 = vadd.f32 %v1470_v63, %v1422_v30 }
 0x1a1   : > { %v1677_v33 = vmul.f32 %v2882_v59, %v1213_v37  ;;  %v1608_v48 = vmax.f32 %v1471_v36, 0.0 }
 0x1a2   : > { %v1519_v38 = vpop.f32.mrf.mxu2 }
 0x1a3   : > { %v1520_v40 = vadd.f32 %v1519_v38, %v2977_v31  ;;  %v1568_v43 = vpop.f32.mrf.mxu3  ;;  %v1723_v45 = vadd.f32 %v1677_v33, %v1676_v7  ;;  %v1732_v53 = vmul.f32 %v2985_v23, %v1608_v48 }
 0x1a4   : > { %v1423_v46 = vpop.f32.mrf.mxu0 }
 0x1a5   : > { %v1569_v49 = vadd.f32 %v1568_v43, %v1520_v40  ;;  %v1424_v54 = vadd.f32 %v1423_v46, %v2973_v28  ;;  %v1472_v59 = vpop.f32.mrf.mxu1  ;;  %1724 = vadd.xlane.f32.xlu0 %v1723_v45 }
 0x1a7   : > { %v1609_v52 = vmax.f32 %v1569_v49, 0.0  ;;  %v1473_v50 = vadd.f32 %v1472_v59, %v1424_v54 }
 0x1a9   : > { %v1733_v56 = vmul.f32 %v2987_v51, %v1609_v52  ;;  %v1610_v61 = vmax.f32 %v1473_v50, 0.0 }
 0x1aa   : > { %v1521_v57 = vpop.f32.mrf.mxu2 }
 0x1ab   : > { %v1522_v5 = vadd.f32 %v1521_v57, %v2977_v31  ;;  %v1570_v58 = vpop.f32.mrf.mxu3  ;;  %v1764_v8 = vadd.f32 %v1733_v56, %v1732_v53  ;;  %v1734_v0 = vmul.f32 %v2985_v23, %v1610_v61 }
 0x1ac   : > { %v1426_v55 = vpop.f32.mrf.mxu0 }
 0x1ad   : > { %v1571_v62 = vadd.f32 %v1570_v58, %v1522_v5  ;;  %v1427_v44 = vadd.f32 %v1426_v55, %v2973_v28  ;;  %v1475_v14 = vpop.f32.mrf.mxu1  ;;  %1765 = vadd.xlane.f32.xlu1 %v1764_v8 }
 0x1af   : > { %v1611_v47 = vmax.f32 %v1571_v62, 0.0  ;;  %v1476_v17 = vadd.f32 %v1475_v14, %v1427_v44 }
 0x1b1   : > { %v1735_v1 = vmul.f32 %v2987_v51, %v1611_v47  ;;  %v1612_v11 = vmax.f32 %v1476_v17, 0.0 }
 0x1b2   : > { %v1524_v2 = vpop.f32.mrf.mxu2 }
 0x1b3   : > { %v1525_v3 = vadd.f32 %v1524_v2, %v2977_v31  ;;  %v1573_v4 = vpop.f32.mrf.mxu3  ;;  %v1767_v9 = vadd.f32 %v1735_v1, %v1734_v0  ;;  %v1736_v18 = vmul.f32 %v2985_v23, %v1612_v11 }
 0x1b4   : > { %v1428_v10 = vpop.f32.mrf.mxu0 }
 0x1b5   : > { %v1574_v12 = vadd.f32 %v1573_v4, %v1525_v3  ;;  %v1429_v13 = vadd.f32 %v1428_v10, %v2973_v28  ;;  %v1477_v15 = vpop.f32.mrf.mxu1  ;;  %1768 = vadd.xlane.f32.xlu2 %v1767_v9 }
 0x1b7   : > { %v1613_v16 = vmax.f32 %v1574_v12, 0.0  ;;  %v1478_v20 = vadd.f32 %v1477_v15, %v1429_v13 }
 0x1b9   : > { %v1737_v19 = vmul.f32 %v2987_v51, %v1613_v16  ;;  %v1614_v25 = vmax.f32 %v1478_v20, 0.0 }
 0x1ba   : > { %v1526_v21 = vpop.f32.mrf.mxu2 }
 0x1bb   : > { %v1527_v39 = vadd.f32 %v1526_v21, %v2977_v31  ;;  %v1575_v41 = vpop.f32.mrf.mxu3  ;;  %v1770_v22 = vadd.f32 %v1737_v19, %v1736_v18  ;;  %v1738_v35 = vmul.f32 %v2985_v23, %v1614_v25 }
 0x1bc   : > { %v1431_v24 = vpop.f32.mrf.mxu0 }
 0x1bd   : > { %v1576_v27 = vadd.f32 %v1575_v41, %v1527_v39  ;;  %v1432_v29 = vadd.f32 %v1431_v24, %v2973_v28  ;;  %v1480_v32 = vpop.f32.mrf.mxu1  ;;  %1771 = vadd.xlane.f32.xlu0 %v1770_v22 }
 0x1bf   : > { %v1615_v34 = vmax.f32 %v1576_v27, 0.0  ;;  %v1481_v6 = vadd.f32 %v1480_v32, %v1432_v29 }
 0x1c1   : > { %v1739_v42 = vmul.f32 %v2987_v51, %v1615_v34  ;;  %v1616_v33 = vmax.f32 %v1481_v6, 0.0 }
 0x1c2   : > { %v1529_v60 = vpop.f32.mrf.mxu2 }
 0x1c3   : > { %v1530_v30 = vadd.f32 %v1529_v60, %v2977_v31  ;;  %v1578_v63 = vpop.f32.mrf.mxu3  ;;  %v1773_v37 = vadd.f32 %v1739_v42, %v1738_v35  ;;  %v1740_v43 = vmul.f32 %v2985_v23, %v1616_v33 }
 0x1c4   : > { %v1433_v7 = vpop.f32.mrf.mxu0 }
 0x1c5   : > { %v1579_v36 = vadd.f32 %v1578_v63, %v1530_v30  ;;  %v1434_v26 = vadd.f32 %v1433_v7, %v2973_v28  ;;  %v1482_v38 = vpop.f32.mrf.mxu1  ;;  %1774 = vadd.xlane.f32.xlu1 %v1773_v37 }
 0x1c7   : > { %v1617_v40 = vmax.f32 %v1579_v36, 0.0  ;;  %v1483_v46 = vadd.f32 %v1482_v38, %v1434_v26 }
 0x1c9   : > { %v1741_v45 = vmul.f32 %v2987_v51, %v1617_v40  ;;  %v1618_v53 = vmax.f32 %v1483_v46, 0.0 }
 0x1ca   : > { %v1531_v48 = vpop.f32.mrf.mxu2 }
 0x1cb   : > { %v1532_v49 = vadd.f32 %v1531_v48, %v2977_v31  ;;  %v1580_v54 = vpop.f32.mrf.mxu3  ;;  %v1776_v59 = vadd.f32 %v1741_v45, %v1740_v43  ;;  %v1742_v58 = vmul.f32 %v2985_v23, %v1618_v53 }
 0x1cc   : > { %v1436_v52 = vpop.f32.mrf.mxu0 }
 0x1cd   : > { %v1581_v56 = vadd.f32 %v1580_v54, %v1532_v49  ;;  %v1437_v50 = vadd.f32 %v1436_v52, %v2973_v28  ;;  %v1485_v57 = vpop.f32.mrf.mxu1  ;;  %1777 = vadd.xlane.f32.xlu2 %v1776_v59 }
 0x1cf   : > { %v1619_v5 = vmax.f32 %v1581_v56, 0.0  ;;  %v1486_v55 = vadd.f32 %v1485_v57, %v1437_v50 }
 0x1d1   : > { %v1743_v8 = vmul.f32 %v2987_v51, %v1619_v5  ;;  %v1620_v0 = vmax.f32 %v1486_v55, 0.0 }
 0x1d2   : > { %v1534_v61 = vpop.f32.mrf.mxu2 }
 0x1d3   : > { %v1535_v62 = vadd.f32 %v1534_v61, %v2977_v31  ;;  %v1583_v44 = vpop.f32.mrf.mxu3  ;;  %v1779_v14 = vadd.f32 %v1743_v8, %v1742_v58  ;;  %v1744_v4 = vmul.f32 %v2985_v23, %v1620_v0 }
 0x1d4   : > { %v1438_v47 = vpop.f32.mrf.mxu0 }
 0x1d5   : > { %v1584_v1 = vadd.f32 %v1583_v44, %v1535_v62  ;;  %v1439_v17 = vadd.f32 %v1438_v47, %v2973_v28  ;;  %v1487_v2 = vpop.f32.mrf.mxu1  ;;  %1780 = vadd.xlane.f32.xlu0 %v1779_v14  ;;  %v3030_v62 = vpop.xlane.xlu1 %1685 }
 0x1d7   : > { %v1621_v3 = vmax.f32 %v1584_v1, 0.0  ;;  %v1488_v10 = vadd.f32 %v1487_v2, %v1439_v17 }
 0x1d9   : > { %v1745_v9 = vmul.f32 %v2987_v51, %v1621_v3  ;;  %v1622_v18 = vmax.f32 %v1488_v10, 0.0  ;;  %v3037_v10 = vpop.xlane.xlu2 %1691 }
 0x1da   : > { %v1536_v11 = vpop.f32.mrf.mxu2 }
 0x1db   : > { %v1537_v12 = vadd.f32 %v1536_v11, %v2977_v31  ;;  %v1585_v13 = vpop.f32.mrf.mxu3  ;;  %v1782_v15 = vadd.f32 %v1745_v9, %v1744_v4  ;;  %v1746_v41 = vmul.f32 %v2985_v23, %v1622_v18  ;;  %v3035_v4 = vpop.xlane.xlu0 %1679 }
 0x1dc   : > { %v1441_v16 = vpop.f32.mrf.mxu0 }
 0x1dd   : > { %v1586_v19 = vadd.f32 %v1585_v13, %v1537_v12  ;;  %v1442_v20 = vadd.f32 %v1441_v16, %v2973_v28  ;;  %v1490_v21 = vpop.f32.mrf.mxu1  ;;  %1783 = vadd.xlane.f32.xlu1 %v1782_v15  ;;  %v3040_v18 = vpop.xlane.xlu1 %1688 }
 0x1df   : > { %v1623_v39 = vmax.f32 %v1586_v19, 0.0  ;;  %v1491_v24 = vadd.f32 %v1490_v21, %v1442_v20 }
 0x1e1   : > { %v1747_v22 = vmul.f32 %v2987_v51, %v1623_v39  ;;  %v1624_v35 = vmax.f32 %v1491_v24, 0.0 }
 0x1e2   : > { %v1539_v25 = vpop.f32.mrf.mxu2 }
 0x1e3   : > { %v1540_v27 = vadd.f32 %v1539_v25, %v2977_v31  ;;  %v1588_v29 = vpop.f32.mrf.mxu3  ;;  %v1785_v32 = vadd.f32 %v1747_v22, %v1746_v41  ;;  %v1748_v63 = vmul.f32 %v2985_v23, %v1624_v35  ;;  %v3046_v35 = vpop.xlane.xlu0 %1682 }
 0x1e4   : > { %v1443_v34 = vpop.f32.mrf.mxu0 }
 0x1e5   : > { %v1589_v42 = vadd.f32 %v1588_v29, %v1540_v27  ;;  %v1444_v6 = vadd.f32 %v1443_v34, %v2973_v28  ;;  %v1492_v60 = vpop.f32.mrf.mxu1  ;;  %1786 = vadd.xlane.f32.xlu2 %v1785_v32 }
 0x1e7   : > { %v1625_v30 = vmax.f32 %v1589_v42, 0.0  ;;  %v1493_v7 = vadd.f32 %v1492_v60, %v1444_v6  ;;  %v3048_v42 = vpop.xlane.xlu2 %1694  ;;  %v3050_v60 = vpop.xlane.xlu1 %1700 }
 0x1e9   : > { %v1749_v37 = vmul.f32 %v2987_v51, %v1625_v30  ;;  %v1626_v43 = vmax.f32 %v1493_v7, 0.0 }
 0x1ea   : > { %v1541_v33 = vpop.f32.mrf.mxu2 }
 0x1eb   : > { %v1542_v36 = vadd.f32 %v1541_v33, %v2977_v31  ;;  %v1590_v26 = vpop.f32.mrf.mxu3  ;;  %v1788_v38 = vadd.f32 %v1749_v37, %v1748_v63  ;;  %v1750_v54 = vmul.f32 %v2985_v23, %v1626_v43 }
 0x1ec   : > { %v1446_v40 = vpop.f32.mrf.mxu0 }
 0x1ed   : > { %v1591_v45 = vadd.f32 %v1590_v26, %v1542_v36  ;;  %v1447_v46 = vadd.f32 %v1446_v40, %v2973_v28  ;;  %v1495_v48 = vpop.f32.mrf.mxu1  ;;  %1789 = vadd.xlane.f32.xlu0 %v1788_v38 }
 0x1ef   : > { %v1627_v49 = vmax.f32 %v1591_v45, 0.0  ;;  %v1496_v52 = vadd.f32 %v1495_v48, %v1447_v46  ;;  %v3056_v48 = vpop.xlane.xlu0 %1697 }
 0x1f1   : > { %v1751_v59 = vmul.f32 %v2987_v51, %v1627_v49  ;;  %v1628_v58 = vmax.f32 %v1496_v52, 0.0  ;;  %v3058_v49 = vpop.xlane.xlu2 %1703 }
 0x1f2   : > { %v1544_v53 = vpop.f32.mrf.mxu2 }
 0x1f3   : > { %v1545_v56 = vadd.f32 %v1544_v53, %v2977_v31  ;;  %v1593_v50 = vpop.f32.mrf.mxu3  ;;  %v1791_v57 = vadd.f32 %v1751_v59, %v1750_v54  ;;  %v1752_v14 = vmul.f32 %v2985_v23, %v1628_v58  ;;  %v3060_v59 = vpop.xlane.xlu1 %1709 }
 0x1f4   : > { %v1448_v5 = vpop.f32.mrf.mxu0 }
 0x1f5   : > { %v1594_v8 = vadd.f32 %v1593_v50, %v1545_v56  ;;  %v1449_v55 = vadd.f32 %v1448_v5, %v2973_v28  ;;  %v1497_v61 = vpop.f32.mrf.mxu1  ;;  %1792 = vadd.xlane.f32.xlu1 %v1791_v57 }
 0x1f7   : > { %v1629_v44 = vmax.f32 %v1594_v8, 0.0  ;;  %v1498_v0 = vadd.f32 %v1497_v61, %v1449_v55 }
 0x1f9   : > { %v1753_v47 = vmul.f32 %v2987_v51, %v1629_v44  ;;  %v1630_v11 = vmax.f32 %v1498_v0, 0.0 }
 0x1fa   : > { %v1546_v1 = vpop.f32.mrf.mxu2 }
 0x1fb   : > { %v1547_v17 = vadd.f32 %v1546_v1, %v2977_v31  ;;  %v1595_v2 = vpop.f32.mrf.mxu3  ;;  %v1794_v3 = vadd.f32 %v1753_v47, %v1752_v14  ;;  %v1754_v19 = vmul.f32 %v2985_v23, %v1630_v11  ;;  %v3066_v14 = vpop.xlane.xlu0 %1706 }
 0x1fc   : > { %v1451_v9 = vpop.f32.mrf.mxu0  ;;  %v3068_v47 = vpop.xlane.xlu2 %1712 }
 0x1fd   : > { %v1596_v12 = vadd.f32 %v1595_v2, %v1547_v17  ;;  %v1452_v13 = vadd.f32 %v1451_v9, %v2973_v28  ;;  %v1500_v15 = vpop.f32.mrf.mxu1  ;;  %1795 = vadd.xlane.f32.xlu2 %v1794_v3 }
 0x1ff   : > { %v1631_v16 = vmax.f32 %v1596_v12, 0.0  ;;  %v1501_v21 = vadd.f32 %v1500_v15, %v1452_v13 }
 0x201   : > { %v1755_v20 = vmul.f32 %v2987_v51, %v1631_v16  ;;  %v1632_v27 = vmax.f32 %v1501_v21, 0.0 }
 0x202   : > { %v1549_v39 = vpop.f32.mrf.mxu2 }
 0x203   : > { %v1550_v41 = vadd.f32 %v1549_v39, %v2977_v31  ;;  %v1598_v22 = vpop.f32.mrf.mxu3  ;;  %v1797_v24 = vadd.f32 %v1755_v20, %v1754_v19  ;;  %v1756_v30 = vmul.f32 %v2985_v23, %v1632_v27  ;;  %v3079_v19 = vld [vmem:[%s3180_s9] ss:$0 sm:$0xff]  ;;  %v1716_v20 = vpop.xlane.xlu0 %1715 }
 0x204   : > { %v1453_v25 = vpop.f32.mrf.mxu0 }
 0x205   : > { %v1599_v29 = vadd.f32 %v1598_v22, %v1550_v41  ;;  %v1454_v32 = vadd.f32 %v1453_v25, %v2973_v28  ;;  %v1502_v34 = vpop.f32.mrf.mxu1  ;;  %1798 = vadd.xlane.f32.xlu0 %v1797_v24 }
 0x207   : > { %v1633_v6 = vmax.f32 %v1599_v29, 0.0  ;;  %v1503_v37 = vadd.f32 %v1502_v34, %v1454_v32 }
 0x208   : > { %v3070_v1 = vpop.xlane.xlu1 %1718 }
 0x209   : > { %v1757_v63 = vmul.f32 %v2987_v51, %v1633_v6  ;;  %v1634_v40 = vmax.f32 %v1503_v37, 0.0 }
 0x20a   : > { %v1551_v7 = vpop.f32.mrf.mxu2 }
 0x20b   : > { %v1552_v33 = vadd.f32 %v1551_v7, %v2977_v31  ;;  %v1600_v36 = vpop.f32.mrf.mxu3  ;;  %v1800_v26 = vadd.f32 %v1757_v63, %v1756_v30  ;;  %v1758_v52 = vmul.f32 %v2985_v23, %v1634_v40 }
 0x20c   : > { %v1456_v38 = vpop.f32.mrf.mxu0 }
 0x20d   : > { %v1601_v43 = vadd.f32 %v1600_v36, %v1552_v33  ;;  %v1457_v45 = vadd.f32 %v1456_v38, %v2973_v28  ;;  %1801 = vadd.xlane.f32.xlu1 %v1800_v26  ;;  %v1505_v46 = vpop.f32.mrf.mxu1 }
 0x20f   : > { %v1635_v54 = vmax.f32 %v1601_v43, 0.0  ;;  %v1506_v56 = vadd.f32 %v1505_v46, %v1457_v45 }
 0x210   : > { %v3081_v39 = vpop.xlane.xlu2 %1721 }
 0x211   : > { %v1759_v53 = vmul.f32 %v2987_v51, %v1635_v54  ;;  %v1636_v55 = vmax.f32 %v1506_v56, 0.0 }
 0x212   : > { %v1554_v50 = vpop.f32.mrf.mxu2 }
 0x213   : > { %v1555_v57 = vadd.f32 %v1554_v50, %v2977_v31  ;;  %v1603_v5 = vpop.f32.mrf.mxu3  ;;  %v1803_v58 = vadd.f32 %v1759_v53, %v1758_v52  ;;  %v1760_v2 = vmul.f32 %v2985_v23, %v1636_v55 }
 0x214   : > { %v1458_v8 = vpop.f32.mrf.mxu0 }
 0x215   : > { %v1604_v61 = vadd.f32 %v1603_v5, %v1555_v57  ;;  %v1459_v44 = vadd.f32 %v1458_v8, %v2973_v28  ;;  %1804 = vadd.xlane.f32.xlu2 %v1803_v58  ;;  %v1507_v17 = vpop.f32.mrf.mxu1 }
 0x217   : > { %v1637_v0 = vmax.f32 %v1604_v61, 0.0  ;;  %v1508_v9 = vadd.f32 %v1507_v17, %v1459_v44 }
 0x219   : > { %v1761_v3 = vmul.f32 %v2987_v51, %v1637_v0  ;;  %v1638_v15 = vmax.f32 %v1508_v9, 0.0 }
 0x21a   : > { %v1556_v11 = vpop.f32.mrf.mxu2 }
 0x21b   : > { %v1557_v12 = vadd.f32 %v1556_v11, %v2977_v31  ;;  %v1806_v13 = vadd.f32 %v1761_v3, %v1760_v2  ;;  %v1605_v28 = vpop.f32.mrf.mxu3  ;;  %v1762_v22 = vmul.f32 %v2985_v23, %v1638_v15  ;;  %v1725_v23 = vpop.xlane.xlu0 %1724 }
 0x21d   : > { %v1606_v16 = vadd.f32 %v1605_v28, %v1557_v12  ;;  %1807 = vadd.xlane.f32.xlu0 %v1806_v13 }
 0x21f   : > { %v1639_v21 = vmax.f32 %v1606_v16, 0.0 }
 0x220   : > { %v1766_v41 = vpop.xlane.xlu1 %1765 }
 0x221   : > { %v1763_v31 = vmul.f32 %v2987_v51, %v1639_v21  ;;  %v1813_v24 = vsel %vm1812_vm1, %v3035_v4, %v1766_v41 }
 0x222   : > { %v1833_v25 = vadd.f32 %v3079_v19, %v1813_v24 }
 0x223   : > { %v1809_v27 = vadd.f32 %v1763_v31, %v1762_v22 }
 0x224   : > { %1850 = vst.msk [vmem:[%s3088_s12] sm:$0xff] %vm1849_vm2, %v1833_v25 }
 0x225   : > { %1810 = vadd.xlane.f32.xlu1 %v1809_v27 }
 0x228   : > { %v1769_v51 = vpop.xlane.xlu2 %1768 }
 0x229   : > { %v1814_v29 = vsel %vm1812_vm1, %v3046_v35, %v1769_v51 }
 0x22a   : > { %v1834_v32 = vadd.f32 %v3079_v19, %v1814_v29 }
 0x22c   : > { %1851 = vst.msk [vmem:[%s3088_s12 + $0x8] sm:$0xff] %vm1849_vm2, %v1834_v32 }
 0x230   : > { %v1772_v34 = vpop.xlane.xlu0 %1771 }
 0x231   : > { %v1815_v4 = vsel %vm1812_vm1, %v3030_v62, %v1772_v34 }
 0x232   : > { %v1835_v6 = vadd.f32 %v3079_v19, %v1815_v4 }
 0x234   : > { %1852 = vst.msk [vmem:[%s3088_s12 + $0x10] sm:$0xff] %vm1849_vm2, %v1835_v6 }
 0x238   : > { %v1775_v30 = vpop.xlane.xlu1 %1774 }
 0x239   : > { %v1816_v63 = vsel %vm1812_vm1, %v3040_v18, %v1775_v30 }
 0x23a   : > { %v1836_v35 = vadd.f32 %v3079_v19, %v1816_v63 }
 0x23c   : > { %1853 = vst.msk [vmem:[%s3088_s12 + $0x18] sm:$0xff] %vm1849_vm2, %v1836_v35 }
 0x240   : > { %v1778_v37 = vpop.xlane.xlu2 %1777 }
 0x241   : > { %v1817_v7 = vsel %vm1812_vm1, %v3037_v10, %v1778_v37 }
 0x242   : > { %v1837_v62 = vadd.f32 %v3079_v19, %v1817_v7 }
 0x244   : > { %1854 = vst.msk [vmem:[%s3088_s12 + $0x20] sm:$0xff] %vm1849_vm2, %v1837_v62 }
 0x248   : > { %v1781_v33 = vpop.xlane.xlu0 %1780 }
 0x249   : > { %v1818_v36 = vsel %vm1812_vm1, %v3048_v42, %v1781_v33 }
 0x24a   : > { %v1838_v18 = vadd.f32 %v3079_v19, %v1818_v36 }
 0x24c   : > { %1855 = vst.msk [vmem:[%s3088_s12 + $0x28] sm:$0xff] %vm1849_vm2, %v1838_v18 }
 0x250   : > { %v1784_v26 = vpop.xlane.xlu1 %1783 }
 0x251   : > { %v1819_v38 = vsel %vm1812_vm1, %v3056_v48, %v1784_v26 }
 0x252   : > { %v1839_v10 = vadd.f32 %v3079_v19, %v1819_v38 }
 0x254   : > { %1856 = vst.msk [vmem:[%s3088_s12 + $0x30] sm:$0xff] %vm1849_vm2, %v1839_v10 }
 0x258   : > { %v1787_v40 = vpop.xlane.xlu2 %1786 }
 0x259   : > { %v1820_v43 = vsel %vm1812_vm1, %v3050_v60, %v1787_v40 }
 0x25a   : > { %v1840_v42 = vadd.f32 %v3079_v19, %v1820_v43 }
 0x25c   : > { %1857 = vst.msk [vmem:[%s3088_s12 + $0x38] sm:$0xff] %vm1849_vm2, %v1840_v42 }
 0x260   : > { %v1790_v45 = vpop.xlane.xlu0 %1789 }
 0x261   : > { %v1821_v46 = vsel %vm1812_vm1, %v3058_v49, %v1790_v45 }
 0x262   : > { %v1841_v48 = vadd.f32 %v3079_v19, %v1821_v46 }
 0x264   : > { %1858 = vst.msk [vmem:[%s3088_s12 + $0x40] sm:$0xff] %vm1849_vm2, %v1841_v48 }
 0x268   : > { %v1793_v54 = vpop.xlane.xlu1 %1792 }
 0x269   : > { %v1822_v52 = vsel %vm1812_vm1, %v3066_v14, %v1793_v54 }
 0x26a   : > { %v1842_v60 = vadd.f32 %v3079_v19, %v1822_v52 }
 0x26c   : > { %1859 = vst.msk [vmem:[%s3088_s12 + $0x48] sm:$0xff] %vm1849_vm2, %v1842_v60 }
 0x270   : > { %v1796_v53 = vpop.xlane.xlu2 %1795 }
 0x271   : > { %v1823_v56 = vsel %vm1812_vm1, %v3060_v59, %v1796_v53 }
 0x272   : > { %v1843_v49 = vadd.f32 %v3079_v19, %v1823_v56 }
 0x274   : > { %1860 = vst.msk [vmem:[%s3088_s12 + $0x50] sm:$0xff] %vm1849_vm2, %v1843_v49 }
 0x278   : > { %v1799_v50 = vpop.xlane.xlu0 %1798 }
 0x279   : > { %v1824_v57 = vsel %vm1812_vm1, %v3068_v47, %v1799_v50 }
 0x27a   : > { %v1844_v5 = vadd.f32 %v3079_v19, %v1824_v57 }
 0x27c   : > { %1861 = vst.msk [vmem:[%s3088_s12 + $0x58] sm:$0xff] %vm1849_vm2, %v1844_v5 }
 0x280   : > { %v1802_v58 = vpop.xlane.xlu1 %1801 }
 0x281   : > { %v1825_v8 = vsel %vm1812_vm1, %v1716_v20, %v1802_v58 }
 0x282   : > { %v1845_v55 = vadd.f32 %v3079_v19, %v1825_v8 }
 0x284   : > { %1862 = vst.msk [vmem:[%s3088_s12 + $0x60] sm:$0xff] %vm1849_vm2, %v1845_v55 }
 0x288   : > { %v1805_v59 = vpop.xlane.xlu2 %1804 }
 0x289   : > { %v1826_v61 = vsel %vm1812_vm1, %v3070_v1, %v1805_v59 }
 0x28a   : > { %v1846_v44 = vadd.f32 %v3079_v19, %v1826_v61 }
 0x28c   : > { %1863 = vst.msk [vmem:[%s3088_s12 + $0x68] sm:$0xff] %vm1849_vm2, %v1846_v44 }
 0x290   : > { %v1808_v14 = vpop.xlane.xlu0 %1807 }
 0x291   : > { %v1827_v47 = vsel %vm1812_vm1, %v3081_v39, %v1808_v14 }
 0x292   : > { %v1847_v0 = vadd.f32 %v3079_v19, %v1827_v47 }
 0x294   : > { %1864 = vst.msk [vmem:[%s3088_s12 + $0x70] sm:$0xff] %vm1849_vm2, %v1847_v0 }
 0x298   : > { %v1811_v17 = vpop.xlane.xlu1 %1810 }
 0x299   : > { %v1828_v2 = vsel %vm1812_vm1, %v1725_v23, %v1811_v17 }
 0x29a   : > { %v1848_v3 = vadd.f32 %v3079_v19, %v1828_v2 }
 0x29c   : > { %1865 = vst.msk [vmem:[%s3088_s12 + $0x78] sm:$0xff] %vm1849_vm2, %v1848_v3 }
 0x29d PF: > { %s21_s13 = sadd.s32 1, %s2421_s13  }
 0x29e   : > { %p18_p7 = scmp.ge.s32.totalorder %s21_s13, 4  }
 0x2a0   :  { %20 = sbr.rel (!%p18_p7) target bundleno = 1 (0x1), region = 95 }
 0x2a5   :  { %1888 = vsyncpa [#allocation3], 1 }
 0x2a6   :  { %1890 = vsyncpa [#allocation3 + $0x1], 1 }

</bundles_post_ra>
